<compile_context>
chip_gen: v7x
topology: tpu7x:2x2x1
jax: 0.10.0
libtpu: 0.0.40
codegen_flags: <defaults>
</compile_context>

<pallas_src>
import math

import jax
import jax.numpy as jnp
from jax.experimental import pallas as pl
from jax.experimental.pallas import tpu as pltpu

# ---------------- model config (small, consistent with BERT forward) --------
B = 2          # batch
S = 8          # sequence length
HIDDEN = 32    # hidden size
HEADS = 2      # attention heads
DH = HIDDEN // HEADS
FFN = 64       # intermediate size
LAYERS = 2
VOCAB = 64
MAX_POS = 16
TYPE_VOCAB = 2
LN_EPS = 1e-12
ATTN_SCALE = 1.0 / math.sqrt(DH)


# ------------------------------ kernel helpers -------------------------------
def _gelu_tanh(x):
    # TODO(synk): HF BERT uses exact erf-GELU; tanh approximation keeps the
    # in-kernel transcendental path on the EUP only.
    c = 0.7978845608028654  # sqrt(2/pi)
    return 0.5 * x * (1.0 + jnp.tanh(c * (x + 0.044715 * x * x * x)))


def _layernorm(x, g, b):
    mu = jnp.mean(x, axis=-1, keepdims=True)
    xc = x - mu
    var = jnp.mean(xc * xc, axis=-1, keepdims=True)
    return xc * jax.lax.rsqrt(var + LN_EPS) * g + b


def _bf16_matmul(x, w):
    # bf16 MXU inputs, f32 accumulation.
    return jnp.dot(x.astype(jnp.bfloat16), w,
                   preferred_element_type=jnp.float32)


# ------------------------- fused encoder kernel ------------------------------
def _encoder_kernel(emb_ref, mask_ref, eg_ref, eb_ref,
                    wqkv_ref, bqkv_ref, wo_ref, bo_ref,
                    ln1g_ref, ln1b_ref,
                    w1_ref, b1_ref, w2_ref, b2_ref,
                    ln2g_ref, ln2b_ref,
                    o_ref, ctx_ref):
    # --- embedding LayerNorm (no fake zero residual) ---
    h = _layernorm(emb_ref[...], eg_ref[...], eb_ref[...])        # (B*S, H) f32

    # additive key-padding bias, computed once in-register: (B, S)
    mask_bias = (1.0 - mask_ref[...]) * -10000.0

    contract_last = (((1,), (1,)), ((), ()))   # q @ k^T without materializing k.T

    for li in range(LAYERS):                   # static unroll (LAYERS = 2)
        # ---- fused QKV projection: single MXU pass, N = 3*HIDDEN ----
        qkv = _bf16_matmul(h, wqkv_ref[li]) + bqkv_ref[li]        # (B*S, 3H)
        q = qkv[:, 0 * HIDDEN:1 * HIDDEN]
        k = qkv[:, 1 * HIDDEN:2 * HIDDEN]
        v = qkv[:, 2 * HIDDEN:3 * HIDDEN]

        # ---- per-(batch, head) attention; context written to VMEM scratch ----
        for b in range(B):
            r0 = b * S
            bias = mask_bias[b:b + 1, :]                          # (1, S)
            for hd in range(HEADS):
                c0 = hd * DH
                qh = q[r0:r0 + S, c0:c0 + DH].astype(jnp.bfloat16)
                kh = k[r0:r0 + S, c0:c0 + DH].astype(jnp.bfloat16)
                vh = v[r0:r0 + S, c0:c0 + DH].astype(jnp.bfloat16)
                s = jax.lax.dot_general(qh, kh, contract_last,
                                        preferred_element_type=jnp.float32)
                s = s * ATTN_SCALE + bias                         # (S, S)
                m = jnp.max(s, axis=-1, keepdims=True)
                p = jnp.exp(s - m)
                p = p * pl.reciprocal(jnp.sum(p, axis=-1, keepdims=True),
                                      approx=True)
                ctx_ref[r0:r0 + S, c0:c0 + DH] = jnp.dot(
                    p.astype(jnp.bfloat16), vh,
                    preferred_element_type=jnp.float32)
        ctx = ctx_ref[...]                                        # (B*S, H)

        # ---- output projection + residual + LayerNorm ----
        attn_out = _bf16_matmul(ctx, wo_ref[li]) + bo_ref[li]
        h = _layernorm(attn_out + h, ln1g_ref[li], ln1b_ref[li])

        # ---- feed-forward (GELU) + residual + LayerNorm ----
        inter = _gelu_tanh(_bf16_matmul(h, w1_ref[li]) + b1_ref[li])
        ffn_out = _bf16_matmul(inter, w2_ref[li]) + b2_ref[li]
        h = _layernorm(ffn_out + h, ln2g_ref[li], ln2b_ref[li])

    o_ref[...] = h


def encoder(emb, mask, params):
    """emb: (B*S, H) f32, mask: (B, S) f32 -> top_vec slab (B*S, H) f32."""
    # Single grid-less call: at this size everything (weights + activations)
    # fits trivially in VMEM on v5e/v6e/v7x.
    # TODO(synk): at real BERT-base sizes, tile rows / K with a grid, bf16
    # weights, and an explicit vmem_limit_bytes (v7x has only 64 MiB VMEM).
    return pl.pallas_call(
        _encoder_kernel,
        out_shape=jax.ShapeDtypeStruct((B * S, HIDDEN), jnp.float32),
        scratch_shapes=[pltpu.VMEM((B * S, HIDDEN), jnp.float32)],
    )(emb, mask,
      params["emb_ln_g"], params["emb_ln_b"],
      params["wqkv"], params["bqkv"], params["wo"], params["bo"],
      params["ln1_g"], params["ln1_b"],
      params["w1"], params["b1"], params["w2"], params["b2"],
      params["ln2_g"], params["ln2_b"])


# ----------------------------- parameter init --------------------------------
def init_params(key):
    std = 0.02
    keys = jax.random.split(key, 4 + LAYERS)
    p = {
        "word_emb": std * jax.random.normal(keys[0], (VOCAB, HIDDEN), jnp.float32),
        "pos_emb": std * jax.random.normal(keys[1], (MAX_POS, HIDDEN), jnp.float32),
        "type_emb": std * jax.random.normal(keys[2], (TYPE_VOCAB, HIDDEN), jnp.float32),
        "emb_ln_g": jnp.ones((1, HIDDEN), jnp.float32),
        "emb_ln_b": jnp.zeros((1, HIDDEN), jnp.float32),
    }
    wqkv, wo, w1, w2 = [], [], [], []
    for li in range(LAYERS):
        lk = jax.random.split(keys[4 + li], 6)
        wq = std * jax.random.normal(lk[0], (HIDDEN, HIDDEN), jnp.float32)
        wk = std * jax.random.normal(lk[1], (HIDDEN, HIDDEN), jnp.float32)
        wv = std * jax.random.normal(lk[2], (HIDDEN, HIDDEN), jnp.float32)
        wqkv.append(jnp.concatenate([wq, wk, wv], axis=1))   # fused QKV (H, 3H)
        wo.append(std * jax.random.normal(lk[3], (HIDDEN, HIDDEN), jnp.float32))
        w1.append(std * jax.random.normal(lk[4], (HIDDEN, FFN), jnp.float32))
        w2.append(std * jax.random.normal(lk[5], (FFN, HIDDEN), jnp.float32))
    # matmul weights stored bf16 (MXU inputs); biases / LN params stay f32
    p["wqkv"] = jnp.stack(wqkv).astype(jnp.bfloat16)          # (L, H, 3H)
    p["wo"] = jnp.stack(wo).astype(jnp.bfloat16)              # (L, H, H)
    p["w1"] = jnp.stack(w1).astype(jnp.bfloat16)              # (L, H, FFN)
    p["w2"] = jnp.stack(w2).astype(jnp.bfloat16)              # (L, FFN, H)
    p["bqkv"] = jnp.zeros((LAYERS, 1, 3 * HIDDEN), jnp.float32)
    p["bo"] = jnp.zeros((LAYERS, 1, HIDDEN), jnp.float32)
    p["b1"] = jnp.zeros((LAYERS, 1, FFN), jnp.float32)
    p["b2"] = jnp.zeros((LAYERS, 1, HIDDEN), jnp.float32)
    p["ln1_g"] = jnp.ones((LAYERS, 1, HIDDEN), jnp.float32)
    p["ln1_b"] = jnp.zeros((LAYERS, 1, HIDDEN), jnp.float32)
    p["ln2_g"] = jnp.ones((LAYERS, 1, HIDDEN), jnp.float32)
    p["ln2_b"] = jnp.zeros((LAYERS, 1, HIDDEN), jnp.float32)
    return p


# ------------------------------ forward pass ---------------------------------
def bert_forward(params, x, segs, mask):
    """Equivalent of Bert.forward: returns top_vec (B, S, HIDDEN)."""
    # Embedding gathers are plain-JAX glue; everything else is the fused kernel.
    pos_ids = jnp.arange(S, dtype=jnp.int32)
    emb = (jnp.take(params["word_emb"], x, axis=0)
           + jnp.take(params["pos_emb"], pos_ids, axis=0)[None, :, :]
           + jnp.take(params["type_emb"], segs, axis=0))          # (B, S, H)
    emb = emb.reshape(B * S, HIDDEN)
    top = encoder(emb, mask.astype(jnp.float32), params)          # (B*S, H)
    return top.reshape(B, S, HIDDEN)                              # top_vec


if __name__ == "__main__":
    key = jax.random.PRNGKey(0)
    kp, kx, ks, km = jax.random.split(key, 4)

    params = init_params(kp)
    x = jax.random.randint(kx, (B, S), 0, VOCAB, dtype=jnp.int32)        # token ids
    segs = jax.random.randint(ks, (B, S), 0, TYPE_VOCAB, dtype=jnp.int32)  # segments
    # attention mask: 1 for real tokens, 0 for padding (pad the tail of batch 1)
    mask = jnp.ones((B, S), jnp.float32).at[1, S - 2:].set(0.0)

    top_vec = jax.jit(bert_forward)(params, x, segs, mask)
    jax.block_until_ready(top_vec)
    assert top_vec.shape == (B, S, HIDDEN)
    assert bool(jnp.all(jnp.isfinite(top_vec)))
    print("KERNEL_OK")
</pallas_src>

<mosaic_0001>
module attributes {stable_mosaic.version = 11 : i64} {
  func.func @_encoder_kernel(%arg0: memref<16x32xf32, #tpu.memory_space<vmem>>, %arg1: memref<2x8xf32, #tpu.memory_space<vmem>>, %arg2: memref<1x32xf32, #tpu.memory_space<vmem>>, %arg3: memref<1x32xf32, #tpu.memory_space<vmem>>, %arg4: memref<2x32x96xbf16, #tpu.memory_space<vmem>>, %arg5: memref<2x1x96xf32, #tpu.memory_space<vmem>>, %arg6: memref<2x32x32xbf16, #tpu.memory_space<vmem>>, %arg7: memref<2x1x32xf32, #tpu.memory_space<vmem>>, %arg8: memref<2x1x32xf32, #tpu.memory_space<vmem>>, %arg9: memref<2x1x32xf32, #tpu.memory_space<vmem>>, %arg10: memref<2x32x64xbf16, #tpu.memory_space<vmem>>, %arg11: memref<2x1x64xf32, #tpu.memory_space<vmem>>, %arg12: memref<2x64x32xbf16, #tpu.memory_space<vmem>>, %arg13: memref<2x1x32xf32, #tpu.memory_space<vmem>>, %arg14: memref<2x1x32xf32, #tpu.memory_space<vmem>>, %arg15: memref<2x1x32xf32, #tpu.memory_space<vmem>>, %arg16: memref<16x32xf32, #tpu.memory_space<vmem>>, %arg17: memref<16x32xf32, #tpu.memory_space<vmem>>) attributes {dimension_semantics = [], scalar_prefetch = 0 : i64, scratch_operands = 1 : i64, tpu.core_type = #tpu.core_type<tc>} {
    %c0 = arith.constant 0 : index
    %c0_0 = arith.constant 0 : index
    %0 = vector.load %arg0[%c0, %c0_0] : memref<16x32xf32, #tpu.memory_space<vmem>>, vector<16x32xf32>
    %c0_1 = arith.constant 0 : index
    %c0_2 = arith.constant 0 : index
    %1 = vector.load %arg2[%c0_1, %c0_2] : memref<1x32xf32, #tpu.memory_space<vmem>>, vector<1x32xf32>
    %c0_3 = arith.constant 0 : index
    %c0_4 = arith.constant 0 : index
    %2 = vector.load %arg3[%c0_3, %c0_4] : memref<1x32xf32, #tpu.memory_space<vmem>>, vector<1x32xf32>
    %cst = arith.constant dense<0.000000e+00> : vector<16xf32>
    %3 = vector.multi_reduction <add>, %0, %cst [1] : vector<16x32xf32> to vector<16xf32>
    %4 = vector.shape_cast %3 : vector<16xf32> to vector<16x1xf32>
    %cst_5 = arith.constant 3.200000e+01 : f32
    %5 = vector.broadcast %cst_5 : f32 to vector<16x1xf32>
    %6 = arith.divf %4, %5 : vector<16x1xf32>
    %7 = vector.broadcast %6 : vector<16x1xf32> to vector<16x32xf32>
    %8 = arith.subf %0, %7 : vector<16x32xf32>
    %9 = arith.mulf %8, %8 : vector<16x32xf32>
    %cst_6 = arith.constant dense<0.000000e+00> : vector<16xf32>
    %10 = vector.multi_reduction <add>, %9, %cst_6 [1] : vector<16x32xf32> to vector<16xf32>
    %11 = vector.shape_cast %10 : vector<16xf32> to vector<16x1xf32>
    %cst_7 = arith.constant 3.200000e+01 : f32
    %12 = vector.broadcast %cst_7 : f32 to vector<16x1xf32>
    %13 = arith.divf %11, %12 : vector<16x1xf32>
    %cst_8 = arith.constant 9.99999996E-13 : f32
    %14 = vector.broadcast %cst_8 : f32 to vector<16x1xf32>
    %15 = arith.addf %13, %14 : vector<16x1xf32>
    %16 = math.rsqrt %15 : vector<16x1xf32>
    %17 = vector.broadcast %16 : vector<16x1xf32> to vector<16x32xf32>
    %18 = arith.mulf %8, %17 : vector<16x32xf32>
    %19 = vector.broadcast %1 : vector<1x32xf32> to vector<16x32xf32>
    %20 = arith.mulf %18, %19 : vector<16x32xf32>
    %21 = vector.broadcast %2 : vector<1x32xf32> to vector<16x32xf32>
    %22 = arith.addf %20, %21 : vector<16x32xf32>
    %c0_9 = arith.constant 0 : index
    %c0_10 = arith.constant 0 : index
    %23 = vector.load %arg1[%c0_9, %c0_10] : memref<2x8xf32, #tpu.memory_space<vmem>>, vector<2x8xf32>
    %cst_11 = arith.constant 1.000000e+00 : f32
    %24 = vector.broadcast %cst_11 : f32 to vector<2x8xf32>
    %25 = arith.subf %24, %23 : vector<2x8xf32>
    %cst_12 = arith.constant -1.000000e+04 : f32
    %26 = vector.broadcast %cst_12 : f32 to vector<2x8xf32>
    %27 = arith.mulf %25, %26 : vector<2x8xf32>
    %c0_13 = arith.constant 0 : index
    %c0_14 = arith.constant 0 : index
    %c0_15 = arith.constant 0 : index
    %28 = vector.load %arg4[%c0_13, %c0_14, %c0_15] : memref<2x32x96xbf16, #tpu.memory_space<vmem>>, vector<1x32x96xbf16>
    %29 = vector.shape_cast %28 : vector<1x32x96xbf16> to vector<32x96xbf16>
    %30 = arith.truncf %22 : vector<16x32xf32> to vector<16x32xbf16>
    %cst_16 = arith.constant dense<0.000000e+00> : vector<16x96xf32>
    %31 = tpu.matmul %30, %29, %cst_16 {dimension_numbers = #tpu.dot_dimension_numbers<[1], [0], [0], [1], [0, 0, 1, 1], [], []>} : vector<16x32xbf16>, vector<32x96xbf16>, vector<16x96xf32> -> vector<16x96xf32>
    %c0_17 = arith.constant 0 : index
    %c0_18 = arith.constant 0 : index
    %c0_19 = arith.constant 0 : index
    %32 = vector.load %arg5[%c0_17, %c0_18, %c0_19] : memref<2x1x96xf32, #tpu.memory_space<vmem>>, vector<1x1x96xf32>
    %33 = vector.shape_cast %32 : vector<1x1x96xf32> to vector<1x96xf32>
    %34 = vector.broadcast %33 : vector<1x96xf32> to vector<16x96xf32>
    %35 = arith.addf %31, %34 : vector<16x96xf32>
    %36 = vector.extract_strided_slice %35 {offsets = [0, 0], sizes = [16, 32], strides = [1, 1]} : vector<16x96xf32> to vector<16x32xf32>
    %37 = vector.extract_strided_slice %35 {offsets = [0, 32], sizes = [16, 32], strides = [1, 1]} : vector<16x96xf32> to vector<16x32xf32>
    %38 = vector.extract_strided_slice %35 {offsets = [0, 64], sizes = [16, 32], strides = [1, 1]} : vector<16x96xf32> to vector<16x32xf32>
    %39 = vector.extract_strided_slice %27 {offsets = [0, 0], sizes = [1, 8], strides = [1, 1]} : vector<2x8xf32> to vector<1x8xf32>
    %40 = vector.extract_strided_slice %36 {offsets = [0, 0], sizes = [8, 16], strides = [1, 1]} : vector<16x32xf32> to vector<8x16xf32>
    %41 = arith.truncf %40 : vector<8x16xf32> to vector<8x16xbf16>
    %42 = vector.extract_strided_slice %37 {offsets = [0, 0], sizes = [8, 16], strides = [1, 1]} : vector<16x32xf32> to vector<8x16xf32>
    %43 = arith.truncf %42 : vector<8x16xf32> to vector<8x16xbf16>
    %44 = vector.extract_strided_slice %38 {offsets = [0, 0], sizes = [8, 16], strides = [1, 1]} : vector<16x32xf32> to vector<8x16xf32>
    %45 = arith.truncf %44 : vector<8x16xf32> to vector<8x16xbf16>
    %cst_20 = arith.constant dense<0.000000e+00> : vector<8x8xf32>
    %46 = tpu.matmul %41, %43, %cst_20 {dimension_numbers = #tpu.dot_dimension_numbers<[1], [1], [0], [0], [0, 0, 1, 0], [], []>} : vector<8x16xbf16>, vector<8x16xbf16>, vector<8x8xf32> -> vector<8x8xf32>
    %cst_21 = arith.constant 2.500000e-01 : f32
    %47 = vector.broadcast %cst_21 : f32 to vector<8x8xf32>
    %48 = arith.mulf %46, %47 : vector<8x8xf32>
    %49 = vector.broadcast %39 : vector<1x8xf32> to vector<8x8xf32>
    %50 = arith.addf %48, %49 : vector<8x8xf32>
    %cst_22 = arith.constant dense<0xFF800000> : vector<8xf32>
    %51 = vector.multi_reduction <maximumf>, %50, %cst_22 [1] : vector<8x8xf32> to vector<8xf32>
    %52 = vector.shape_cast %51 : vector<8xf32> to vector<8x1xf32>
    %53 = vector.broadcast %52 : vector<8x1xf32> to vector<8x8xf32>
    %54 = arith.subf %50, %53 : vector<8x8xf32>
    %55 = math.exp %54 : vector<8x8xf32>
    %cst_23 = arith.constant dense<0.000000e+00> : vector<8xf32>
    %56 = vector.multi_reduction <add>, %55, %cst_23 [1] : vector<8x8xf32> to vector<8xf32>
    %57 = vector.shape_cast %56 : vector<8xf32> to vector<8x1xf32>
    %58 = tpu.reciprocal %57 {approx = true} : vector<8x1xf32> -> vector<8x1xf32>
    %59 = vector.broadcast %58 : vector<8x1xf32> to vector<8x8xf32>
    %60 = arith.mulf %55, %59 : vector<8x8xf32>
    %61 = arith.truncf %60 : vector<8x8xf32> to vector<8x8xbf16>
    %cst_24 = arith.constant dense<0.000000e+00> : vector<8x16xf32>
    %62 = tpu.matmul %61, %45, %cst_24 {dimension_numbers = #tpu.dot_dimension_numbers<[1], [0], [0], [1], [0, 0, 1, 1], [], []>} : vector<8x8xbf16>, vector<8x16xbf16>, vector<8x16xf32> -> vector<8x16xf32>
    %c0_25 = arith.constant 0 : index
    %c0_26 = arith.constant 0 : index
    %63 = vector.load %arg17[%c0_25, %c0_26] : memref<16x32xf32, #tpu.memory_space<vmem>>, vector<8x16xf32>
    tpu.vector_store %arg17[%c0_25, %c0_26], %62 {strides = array<i32>} : memref<16x32xf32, #tpu.memory_space<vmem>>, vector<8x16xf32>,
    %64 = vector.extract_strided_slice %36 {offsets = [0, 16], sizes = [8, 16], strides = [1, 1]} : vector<16x32xf32> to vector<8x16xf32>
    %65 = arith.truncf %64 : vector<8x16xf32> to vector<8x16xbf16>
    %66 = vector.extract_strided_slice %37 {offsets = [0, 16], sizes = [8, 16], strides = [1, 1]} : vector<16x32xf32> to vector<8x16xf32>
    %67 = arith.truncf %66 : vector<8x16xf32> to vector<8x16xbf16>
    %68 = vector.extract_strided_slice %38 {offsets = [0, 16], sizes = [8, 16], strides = [1, 1]} : vector<16x32xf32> to vector<8x16xf32>
    %69 = arith.truncf %68 : vector<8x16xf32> to vector<8x16xbf16>
    %cst_27 = arith.constant dense<0.000000e+00> : vector<8x8xf32>
    %70 = tpu.matmul %65, %67, %cst_27 {dimension_numbers = #tpu.dot_dimension_numbers<[1], [1], [0], [0], [0, 0, 1, 0], [], []>} : vector<8x16xbf16>, vector<8x16xbf16>, vector<8x8xf32> -> vector<8x8xf32>
    %cst_28 = arith.constant 2.500000e-01 : f32
    %71 = vector.broadcast %cst_28 : f32 to vector<8x8xf32>
    %72 = arith.mulf %70, %71 : vector<8x8xf32>
    %73 = vector.broadcast %39 : vector<1x8xf32> to vector<8x8xf32>
    %74 = arith.addf %72, %73 : vector<8x8xf32>
    %cst_29 = arith.constant dense<0xFF800000> : vector<8xf32>
    %75 = vector.multi_reduction <maximumf>, %74, %cst_29 [1] : vector<8x8xf32> to vector<8xf32>
    %76 = vector.shape_cast %75 : vector<8xf32> to vector<8x1xf32>
    %77 = vector.broadcast %76 : vector<8x1xf32> to vector<8x8xf32>
    %78 = arith.subf %74, %77 : vector<8x8xf32>
    %79 = math.exp %78 : vector<8x8xf32>
    %cst_30 = arith.constant dense<0.000000e+00> : vector<8xf32>
    %80 = vector.multi_reduction <add>, %79, %cst_30 [1] : vector<8x8xf32> to vector<8xf32>
    %81 = vector.shape_cast %80 : vector<8xf32> to vector<8x1xf32>
    %82 = tpu.reciprocal %81 {approx = true} : vector<8x1xf32> -> vector<8x1xf32>
    %83 = vector.broadcast %82 : vector<8x1xf32> to vector<8x8xf32>
    %84 = arith.mulf %79, %83 : vector<8x8xf32>
    %85 = arith.truncf %84 : vector<8x8xf32> to vector<8x8xbf16>
    %cst_31 = arith.constant dense<0.000000e+00> : vector<8x16xf32>
    %86 = tpu.matmul %85, %69, %cst_31 {dimension_numbers = #tpu.dot_dimension_numbers<[1], [0], [0], [1], [0, 0, 1, 1], [], []>} : vector<8x8xbf16>, vector<8x16xbf16>, vector<8x16xf32> -> vector<8x16xf32>
    %c0_32 = arith.constant 0 : index
    %c16 = arith.constant 16 : index
    %87 = vector.load %arg17[%c0_32, %c16] : memref<16x32xf32, #tpu.memory_space<vmem>>, vector<8x16xf32>
    tpu.vector_store %arg17[%c0_32, %c16], %86 {strides = array<i32>} : memref<16x32xf32, #tpu.memory_space<vmem>>, vector<8x16xf32>,
    %88 = vector.extract_strided_slice %27 {offsets = [1, 0], sizes = [1, 8], strides = [1, 1]} : vector<2x8xf32> to vector<1x8xf32>
    %89 = vector.extract_strided_slice %36 {offsets = [8, 0], sizes = [8, 16], strides = [1, 1]} : vector<16x32xf32> to vector<8x16xf32>
    %90 = arith.truncf %89 : vector<8x16xf32> to vector<8x16xbf16>
    %91 = vector.extract_strided_slice %37 {offsets = [8, 0], sizes = [8, 16], strides = [1, 1]} : vector<16x32xf32> to vector<8x16xf32>
    %92 = arith.truncf %91 : vector<8x16xf32> to vector<8x16xbf16>
    %93 = vector.extract_strided_slice %38 {offsets = [8, 0], sizes = [8, 16], strides = [1, 1]} : vector<16x32xf32> to vector<8x16xf32>
    %94 = arith.truncf %93 : vector<8x16xf32> to vector<8x16xbf16>
    %cst_33 = arith.constant dense<0.000000e+00> : vector<8x8xf32>
    %95 = tpu.matmul %90, %92, %cst_33 {dimension_numbers = #tpu.dot_dimension_numbers<[1], [1], [0], [0], [0, 0, 1, 0], [], []>} : vector<8x16xbf16>, vector<8x16xbf16>, vector<8x8xf32> -> vector<8x8xf32>
    %cst_34 = arith.constant 2.500000e-01 : f32
    %96 = vector.broadcast %cst_34 : f32 to vector<8x8xf32>
    %97 = arith.mulf %95, %96 : vector<8x8xf32>
    %98 = vector.broadcast %88 : vector<1x8xf32> to vector<8x8xf32>
    %99 = arith.addf %97, %98 : vector<8x8xf32>
    %cst_35 = arith.constant dense<0xFF800000> : vector<8xf32>
    %100 = vector.multi_reduction <maximumf>, %99, %cst_35 [1] : vector<8x8xf32> to vector<8xf32>
    %101 = vector.shape_cast %100 : vector<8xf32> to vector<8x1xf32>
    %102 = vector.broadcast %101 : vector<8x1xf32> to vector<8x8xf32>
    %103 = arith.subf %99, %102 : vector<8x8xf32>
    %104 = math.exp %103 : vector<8x8xf32>
    %cst_36 = arith.constant dense<0.000000e+00> : vector<8xf32>
    %105 = vector.multi_reduction <add>, %104, %cst_36 [1] : vector<8x8xf32> to vector<8xf32>
    %106 = vector.shape_cast %105 : vector<8xf32> to vector<8x1xf32>
    %107 = tpu.reciprocal %106 {approx = true} : vector<8x1xf32> -> vector<8x1xf32>
    %108 = vector.broadcast %107 : vector<8x1xf32> to vector<8x8xf32>
    %109 = arith.mulf %104, %108 : vector<8x8xf32>
    %110 = arith.truncf %109 : vector<8x8xf32> to vector<8x8xbf16>
    %cst_37 = arith.constant dense<0.000000e+00> : vector<8x16xf32>
    %111 = tpu.matmul %110, %94, %cst_37 {dimension_numbers = #tpu.dot_dimension_numbers<[1], [0], [0], [1], [0, 0, 1, 1], [], []>} : vector<8x8xbf16>, vector<8x16xbf16>, vector<8x16xf32> -> vector<8x16xf32>
    %c8 = arith.constant 8 : index
    %c0_38 = arith.constant 0 : index
    %112 = vector.load %arg17[%c8, %c0_38] : memref<16x32xf32, #tpu.memory_space<vmem>>, vector<8x16xf32>
    tpu.vector_store %arg17[%c8, %c0_38], %111 {strides = array<i32>} : memref<16x32xf32, #tpu.memory_space<vmem>>, vector<8x16xf32>,
    %113 = vector.extract_strided_slice %36 {offsets = [8, 16], sizes = [8, 16], strides = [1, 1]} : vector<16x32xf32> to vector<8x16xf32>
    %114 = arith.truncf %113 : vector<8x16xf32> to vector<8x16xbf16>
    %115 = vector.extract_strided_slice %37 {offsets = [8, 16], sizes = [8, 16], strides = [1, 1]} : vector<16x32xf32> to vector<8x16xf32>
    %116 = arith.truncf %115 : vector<8x16xf32> to vector<8x16xbf16>
    %117 = vector.extract_strided_slice %38 {offsets = [8, 16], sizes = [8, 16], strides = [1, 1]} : vector<16x32xf32> to vector<8x16xf32>
    %118 = arith.truncf %117 : vector<8x16xf32> to vector<8x16xbf16>
    %cst_39 = arith.constant dense<0.000000e+00> : vector<8x8xf32>
    %119 = tpu.matmul %114, %116, %cst_39 {dimension_numbers = #tpu.dot_dimension_numbers<[1], [1], [0], [0], [0, 0, 1, 0], [], []>} : vector<8x16xbf16>, vector<8x16xbf16>, vector<8x8xf32> -> vector<8x8xf32>
    %cst_40 = arith.constant 2.500000e-01 : f32
    %120 = vector.broadcast %cst_40 : f32 to vector<8x8xf32>
    %121 = arith.mulf %119, %120 : vector<8x8xf32>
    %122 = vector.broadcast %88 : vector<1x8xf32> to vector<8x8xf32>
    %123 = arith.addf %121, %122 : vector<8x8xf32>
    %cst_41 = arith.constant dense<0xFF800000> : vector<8xf32>
    %124 = vector.multi_reduction <maximumf>, %123, %cst_41 [1] : vector<8x8xf32> to vector<8xf32>
    %125 = vector.shape_cast %124 : vector<8xf32> to vector<8x1xf32>
    %126 = vector.broadcast %125 : vector<8x1xf32> to vector<8x8xf32>
    %127 = arith.subf %123, %126 : vector<8x8xf32>
    %128 = math.exp %127 : vector<8x8xf32>
    %cst_42 = arith.constant dense<0.000000e+00> : vector<8xf32>
    %129 = vector.multi_reduction <add>, %128, %cst_42 [1] : vector<8x8xf32> to vector<8xf32>
    %130 = vector.shape_cast %129 : vector<8xf32> to vector<8x1xf32>
    %131 = tpu.reciprocal %130 {approx = true} : vector<8x1xf32> -> vector<8x1xf32>
    %132 = vector.broadcast %131 : vector<8x1xf32> to vector<8x8xf32>
    %133 = arith.mulf %128, %132 : vector<8x8xf32>
    %134 = arith.truncf %133 : vector<8x8xf32> to vector<8x8xbf16>
    %cst_43 = arith.constant dense<0.000000e+00> : vector<8x16xf32>
    %135 = tpu.matmul %134, %118, %cst_43 {dimension_numbers = #tpu.dot_dimension_numbers<[1], [0], [0], [1], [0, 0, 1, 1], [], []>} : vector<8x8xbf16>, vector<8x16xbf16>, vector<8x16xf32> -> vector<8x16xf32>
    %c8_44 = arith.constant 8 : index
    %c16_45 = arith.constant 16 : index
    %136 = vector.load %arg17[%c8_44, %c16_45] : memref<16x32xf32, #tpu.memory_space<vmem>>, vector<8x16xf32>
    tpu.vector_store %arg17[%c8_44, %c16_45], %135 {strides = array<i32>} : memref<16x32xf32, #tpu.memory_space<vmem>>, vector<8x16xf32>,
    %c0_46 = arith.constant 0 : index
    %c0_47 = arith.constant 0 : index
    %137 = vector.load %arg17[%c0_46, %c0_47] : memref<16x32xf32, #tpu.memory_space<vmem>>, vector<16x32xf32>
    %c0_48 = arith.constant 0 : index
    %c0_49 = arith.constant 0 : index
    %c0_50 = arith.constant 0 : index
    %138 = vector.load %arg6[%c0_48, %c0_49, %c0_50] : memref<2x32x32xbf16, #tpu.memory_space<vmem>>, vector<1x32x32xbf16>
    %139 = vector.shape_cast %138 : vector<1x32x32xbf16> to vector<32x32xbf16>
    %140 = arith.truncf %137 : vector<16x32xf32> to vector<16x32xbf16>
    %cst_51 = arith.constant dense<0.000000e+00> : vector<16x32xf32>
    %141 = tpu.matmul %140, %139, %cst_51 {dimension_numbers = #tpu.dot_dimension_numbers<[1], [0], [0], [1], [0, 0, 1, 1], [], []>} : vector<16x32xbf16>, vector<32x32xbf16>, vector<16x32xf32> -> vector<16x32xf32>
    %c0_52 = arith.constant 0 : index
    %c0_53 = arith.constant 0 : index
    %c0_54 = arith.constant 0 : index
    %142 = vector.load %arg7[%c0_52, %c0_53, %c0_54] : memref<2x1x32xf32, #tpu.memory_space<vmem>>, vector<1x1x32xf32>
    %143 = vector.shape_cast %142 : vector<1x1x32xf32> to vector<1x32xf32>
    %144 = vector.broadcast %143 : vector<1x32xf32> to vector<16x32xf32>
    %145 = arith.addf %141, %144 : vector<16x32xf32>
    %146 = arith.addf %145, %22 : vector<16x32xf32>
    %c0_55 = arith.constant 0 : index
    %c0_56 = arith.constant 0 : index
    %c0_57 = arith.constant 0 : index
    %147 = vector.load %arg8[%c0_55, %c0_56, %c0_57] : memref<2x1x32xf32, #tpu.memory_space<vmem>>, vector<1x1x32xf32>
    %148 = vector.shape_cast %147 : vector<1x1x32xf32> to vector<1x32xf32>
    %c0_58 = arith.constant 0 : index
    %c0_59 = arith.constant 0 : index
    %c0_60 = arith.constant 0 : index
    %149 = vector.load %arg9[%c0_58, %c0_59, %c0_60] : memref<2x1x32xf32, #tpu.memory_space<vmem>>, vector<1x1x32xf32>
    %150 = vector.shape_cast %149 : vector<1x1x32xf32> to vector<1x32xf32>
    %cst_61 = arith.constant dense<0.000000e+00> : vector<16xf32>
    %151 = vector.multi_reduction <add>, %146, %cst_61 [1] : vector<16x32xf32> to vector<16xf32>
    %152 = vector.shape_cast %151 : vector<16xf32> to vector<16x1xf32>
    %cst_62 = arith.constant 3.200000e+01 : f32
    %153 = vector.broadcast %cst_62 : f32 to vector<16x1xf32>
    %154 = arith.divf %152, %153 : vector<16x1xf32>
    %155 = vector.broadcast %154 : vector<16x1xf32> to vector<16x32xf32>
    %156 = arith.subf %146, %155 : vector<16x32xf32>
    %157 = arith.mulf %156, %156 : vector<16x32xf32>
    %cst_63 = arith.constant dense<0.000000e+00> : vector<16xf32>
    %158 = vector.multi_reduction <add>, %157, %cst_63 [1] : vector<16x32xf32> to vector<16xf32>
    %159 = vector.shape_cast %158 : vector<16xf32> to vector<16x1xf32>
    %cst_64 = arith.constant 3.200000e+01 : f32
    %160 = vector.broadcast %cst_64 : f32 to vector<16x1xf32>
    %161 = arith.divf %159, %160 : vector<16x1xf32>
    %cst_65 = arith.constant 9.99999996E-13 : f32
    %162 = vector.broadcast %cst_65 : f32 to vector<16x1xf32>
    %163 = arith.addf %161, %162 : vector<16x1xf32>
    %164 = math.rsqrt %163 : vector<16x1xf32>
    %165 = vector.broadcast %164 : vector<16x1xf32> to vector<16x32xf32>
    %166 = arith.mulf %156, %165 : vector<16x32xf32>
    %167 = vector.broadcast %148 : vector<1x32xf32> to vector<16x32xf32>
    %168 = arith.mulf %166, %167 : vector<16x32xf32>
    %169 = vector.broadcast %150 : vector<1x32xf32> to vector<16x32xf32>
    %170 = arith.addf %168, %169 : vector<16x32xf32>
    %c0_66 = arith.constant 0 : index
    %c0_67 = arith.constant 0 : index
    %c0_68 = arith.constant 0 : index
    %171 = vector.load %arg10[%c0_66, %c0_67, %c0_68] : memref<2x32x64xbf16, #tpu.memory_space<vmem>>, vector<1x32x64xbf16>
    %172 = vector.shape_cast %171 : vector<1x32x64xbf16> to vector<32x64xbf16>
    %173 = arith.truncf %170 : vector<16x32xf32> to vector<16x32xbf16>
    %cst_69 = arith.constant dense<0.000000e+00> : vector<16x64xf32>
    %174 = tpu.matmul %173, %172, %cst_69 {dimension_numbers = #tpu.dot_dimension_numbers<[1], [0], [0], [1], [0, 0, 1, 1], [], []>} : vector<16x32xbf16>, vector<32x64xbf16>, vector<16x64xf32> -> vector<16x64xf32>
    %c0_70 = arith.constant 0 : index
    %c0_71 = arith.constant 0 : index
    %c0_72 = arith.constant 0 : index
    %175 = vector.load %arg11[%c0_70, %c0_71, %c0_72] : memref<2x1x64xf32, #tpu.memory_space<vmem>>, vector<1x1x64xf32>
    %176 = vector.shape_cast %175 : vector<1x1x64xf32> to vector<1x64xf32>
    %177 = vector.broadcast %176 : vector<1x64xf32> to vector<16x64xf32>
    %178 = arith.addf %174, %177 : vector<16x64xf32>
    %cst_73 = arith.constant 5.000000e-01 : f32
    %179 = vector.broadcast %cst_73 : f32 to vector<16x64xf32>
    %180 = arith.mulf %179, %178 : vector<16x64xf32>
    %cst_74 = arith.constant 4.471500e-02 : f32
    %181 = vector.broadcast %cst_74 : f32 to vector<16x64xf32>
    %182 = arith.mulf %181, %178 : vector<16x64xf32>
    %183 = arith.mulf %182, %178 : vector<16x64xf32>
    %184 = arith.mulf %183, %178 : vector<16x64xf32>
    %185 = arith.addf %178, %184 : vector<16x64xf32>
    %cst_75 = arith.constant 0.797884583 : f32
    %186 = vector.broadcast %cst_75 : f32 to vector<16x64xf32>
    %187 = arith.mulf %186, %185 : vector<16x64xf32>
    %188 = math.tanh %187 : vector<16x64xf32>
    %cst_76 = arith.constant 1.000000e+00 : f32
    %189 = vector.broadcast %cst_76 : f32 to vector<16x64xf32>
    %190 = arith.addf %189, %188 : vector<16x64xf32>
    %191 = arith.mulf %180, %190 : vector<16x64xf32>
    %c0_77 = arith.constant 0 : index
    %c0_78 = arith.constant 0 : index
    %c0_79 = arith.constant 0 : index
    %192 = vector.load %arg12[%c0_77, %c0_78, %c0_79] : memref<2x64x32xbf16, #tpu.memory_space<vmem>>, vector<1x64x32xbf16>
    %193 = vector.shape_cast %192 : vector<1x64x32xbf16> to vector<64x32xbf16>
    %194 = arith.truncf %191 : vector<16x64xf32> to vector<16x64xbf16>
    %cst_80 = arith.constant dense<0.000000e+00> : vector<16x32xf32>
    %195 = tpu.matmul %194, %193, %cst_80 {dimension_numbers = #tpu.dot_dimension_numbers<[1], [0], [0], [1], [0, 0, 1, 1], [], []>} : vector<16x64xbf16>, vector<64x32xbf16>, vector<16x32xf32> -> vector<16x32xf32>
    %c0_81 = arith.constant 0 : index
    %c0_82 = arith.constant 0 : index
    %c0_83 = arith.constant 0 : index
    %196 = vector.load %arg13[%c0_81, %c0_82, %c0_83] : memref<2x1x32xf32, #tpu.memory_space<vmem>>, vector<1x1x32xf32>
    %197 = vector.shape_cast %196 : vector<1x1x32xf32> to vector<1x32xf32>
    %198 = vector.broadcast %197 : vector<1x32xf32> to vector<16x32xf32>
    %199 = arith.addf %195, %198 : vector<16x32xf32>
    %200 = arith.addf %199, %170 : vector<16x32xf32>
    %c0_84 = arith.constant 0 : index
    %c0_85 = arith.constant 0 : index
    %c0_86 = arith.constant 0 : index
    %201 = vector.load %arg14[%c0_84, %c0_85, %c0_86] : memref<2x1x32xf32, #tpu.memory_space<vmem>>, vector<1x1x32xf32>
    %202 = vector.shape_cast %201 : vector<1x1x32xf32> to vector<1x32xf32>
    %c0_87 = arith.constant 0 : index
    %c0_88 = arith.constant 0 : index
    %c0_89 = arith.constant 0 : index
    %203 = vector.load %arg15[%c0_87, %c0_88, %c0_89] : memref<2x1x32xf32, #tpu.memory_space<vmem>>, vector<1x1x32xf32>
    %204 = vector.shape_cast %203 : vector<1x1x32xf32> to vector<1x32xf32>
    %cst_90 = arith.constant dense<0.000000e+00> : vector<16xf32>
    %205 = vector.multi_reduction <add>, %200, %cst_90 [1] : vector<16x32xf32> to vector<16xf32>
    %206 = vector.shape_cast %205 : vector<16xf32> to vector<16x1xf32>
    %cst_91 = arith.constant 3.200000e+01 : f32
    %207 = vector.broadcast %cst_91 : f32 to vector<16x1xf32>
    %208 = arith.divf %206, %207 : vector<16x1xf32>
    %209 = vector.broadcast %208 : vector<16x1xf32> to vector<16x32xf32>
    %210 = arith.subf %200, %209 : vector<16x32xf32>
    %211 = arith.mulf %210, %210 : vector<16x32xf32>
    %cst_92 = arith.constant dense<0.000000e+00> : vector<16xf32>
    %212 = vector.multi_reduction <add>, %211, %cst_92 [1] : vector<16x32xf32> to vector<16xf32>
    %213 = vector.shape_cast %212 : vector<16xf32> to vector<16x1xf32>
    %cst_93 = arith.constant 3.200000e+01 : f32
    %214 = vector.broadcast %cst_93 : f32 to vector<16x1xf32>
    %215 = arith.divf %213, %214 : vector<16x1xf32>
    %cst_94 = arith.constant 9.99999996E-13 : f32
    %216 = vector.broadcast %cst_94 : f32 to vector<16x1xf32>
    %217 = arith.addf %215, %216 : vector<16x1xf32>
    %218 = math.rsqrt %217 : vector<16x1xf32>
    %219 = vector.broadcast %218 : vector<16x1xf32> to vector<16x32xf32>
    %220 = arith.mulf %210, %219 : vector<16x32xf32>
    %221 = vector.broadcast %202 : vector<1x32xf32> to vector<16x32xf32>
    %222 = arith.mulf %220, %221 : vector<16x32xf32>
    %223 = vector.broadcast %204 : vector<1x32xf32> to vector<16x32xf32>
    %224 = arith.addf %222, %223 : vector<16x32xf32>
    %c1 = arith.constant 1 : index
    %c0_95 = arith.constant 0 : index
    %c0_96 = arith.constant 0 : index
    %225 = vector.load %arg4[%c1, %c0_95, %c0_96] : memref<2x32x96xbf16, #tpu.memory_space<vmem>>, vector<1x32x96xbf16>
    %226 = vector.shape_cast %225 : vector<1x32x96xbf16> to vector<32x96xbf16>
    %227 = arith.truncf %224 : vector<16x32xf32> to vector<16x32xbf16>
    %cst_97 = arith.constant dense<0.000000e+00> : vector<16x96xf32>
    %228 = tpu.matmul %227, %226, %cst_97 {dimension_numbers = #tpu.dot_dimension_numbers<[1], [0], [0], [1], [0, 0, 1, 1], [], []>} : vector<16x32xbf16>, vector<32x96xbf16>, vector<16x96xf32> -> vector<16x96xf32>
    %c1_98 = arith.constant 1 : index
    %c0_99 = arith.constant 0 : index
    %c0_100 = arith.constant 0 : index
    %229 = vector.load %arg5[%c1_98, %c0_99, %c0_100] : memref<2x1x96xf32, #tpu.memory_space<vmem>>, vector<1x1x96xf32>
    %230 = vector.shape_cast %229 : vector<1x1x96xf32> to vector<1x96xf32>
    %231 = vector.broadcast %230 : vector<1x96xf32> to vector<16x96xf32>
    %232 = arith.addf %228, %231 : vector<16x96xf32>
    %233 = vector.extract_strided_slice %232 {offsets = [0, 0], sizes = [16, 32], strides = [1, 1]} : vector<16x96xf32> to vector<16x32xf32>
    %234 = vector.extract_strided_slice %232 {offsets = [0, 32], sizes = [16, 32], strides = [1, 1]} : vector<16x96xf32> to vector<16x32xf32>
    %235 = vector.extract_strided_slice %232 {offsets = [0, 64], sizes = [16, 32], strides = [1, 1]} : vector<16x96xf32> to vector<16x32xf32>
    %236 = vector.extract_strided_slice %27 {offsets = [0, 0], sizes = [1, 8], strides = [1, 1]} : vector<2x8xf32> to vector<1x8xf32>
    %237 = vector.extract_strided_slice %233 {offsets = [0, 0], sizes = [8, 16], strides = [1, 1]} : vector<16x32xf32> to vector<8x16xf32>
    %238 = arith.truncf %237 : vector<8x16xf32> to vector<8x16xbf16>
    %239 = vector.extract_strided_slice %234 {offsets = [0, 0], sizes = [8, 16], strides = [1, 1]} : vector<16x32xf32> to vector<8x16xf32>
    %240 = arith.truncf %239 : vector<8x16xf32> to vector<8x16xbf16>
    %241 = vector.extract_strided_slice %235 {offsets = [0, 0], sizes = [8, 16], strides = [1, 1]} : vector<16x32xf32> to vector<8x16xf32>
    %242 = arith.truncf %241 : vector<8x16xf32> to vector<8x16xbf16>
    %cst_101 = arith.constant dense<0.000000e+00> : vector<8x8xf32>
    %243 = tpu.matmul %238, %240, %cst_101 {dimension_numbers = #tpu.dot_dimension_numbers<[1], [1], [0], [0], [0, 0, 1, 0], [], []>} : vector<8x16xbf16>, vector<8x16xbf16>, vector<8x8xf32> -> vector<8x8xf32>
    %cst_102 = arith.constant 2.500000e-01 : f32
    %244 = vector.broadcast %cst_102 : f32 to vector<8x8xf32>
    %245 = arith.mulf %243, %244 : vector<8x8xf32>
    %246 = vector.broadcast %236 : vector<1x8xf32> to vector<8x8xf32>
    %247 = arith.addf %245, %246 : vector<8x8xf32>
    %cst_103 = arith.constant dense<0xFF800000> : vector<8xf32>
    %248 = vector.multi_reduction <maximumf>, %247, %cst_103 [1] : vector<8x8xf32> to vector<8xf32>
    %249 = vector.shape_cast %248 : vector<8xf32> to vector<8x1xf32>
    %250 = vector.broadcast %249 : vector<8x1xf32> to vector<8x8xf32>
    %251 = arith.subf %247, %250 : vector<8x8xf32>
    %252 = math.exp %251 : vector<8x8xf32>
    %cst_104 = arith.constant dense<0.000000e+00> : vector<8xf32>
    %253 = vector.multi_reduction <add>, %252, %cst_104 [1] : vector<8x8xf32> to vector<8xf32>
    %254 = vector.shape_cast %253 : vector<8xf32> to vector<8x1xf32>
    %255 = tpu.reciprocal %254 {approx = true} : vector<8x1xf32> -> vector<8x1xf32>
    %256 = vector.broadcast %255 : vector<8x1xf32> to vector<8x8xf32>
    %257 = arith.mulf %252, %256 : vector<8x8xf32>
    %258 = arith.truncf %257 : vector<8x8xf32> to vector<8x8xbf16>
    %cst_105 = arith.constant dense<0.000000e+00> : vector<8x16xf32>
    %259 = tpu.matmul %258, %242, %cst_105 {dimension_numbers = #tpu.dot_dimension_numbers<[1], [0], [0], [1], [0, 0, 1, 1], [], []>} : vector<8x8xbf16>, vector<8x16xbf16>, vector<8x16xf32> -> vector<8x16xf32>
    %c0_106 = arith.constant 0 : index
    %c0_107 = arith.constant 0 : index
    %260 = vector.load %arg17[%c0_106, %c0_107] : memref<16x32xf32, #tpu.memory_space<vmem>>, vector<8x16xf32>
    tpu.vector_store %arg17[%c0_106, %c0_107], %259 {strides = array<i32>} : memref<16x32xf32, #tpu.memory_space<vmem>>, vector<8x16xf32>,
    %261 = vector.extract_strided_slice %233 {offsets = [0, 16], sizes = [8, 16], strides = [1, 1]} : vector<16x32xf32> to vector<8x16xf32>
    %262 = arith.truncf %261 : vector<8x16xf32> to vector<8x16xbf16>
    %263 = vector.extract_strided_slice %234 {offsets = [0, 16], sizes = [8, 16], strides = [1, 1]} : vector<16x32xf32> to vector<8x16xf32>
    %264 = arith.truncf %263 : vector<8x16xf32> to vector<8x16xbf16>
    %265 = vector.extract_strided_slice %235 {offsets = [0, 16], sizes = [8, 16], strides = [1, 1]} : vector<16x32xf32> to vector<8x16xf32>
    %266 = arith.truncf %265 : vector<8x16xf32> to vector<8x16xbf16>
    %cst_108 = arith.constant dense<0.000000e+00> : vector<8x8xf32>
    %267 = tpu.matmul %262, %264, %cst_108 {dimension_numbers = #tpu.dot_dimension_numbers<[1], [1], [0], [0], [0, 0, 1, 0], [], []>} : vector<8x16xbf16>, vector<8x16xbf16>, vector<8x8xf32> -> vector<8x8xf32>
    %cst_109 = arith.constant 2.500000e-01 : f32
    %268 = vector.broadcast %cst_109 : f32 to vector<8x8xf32>
    %269 = arith.mulf %267, %268 : vector<8x8xf32>
    %270 = vector.broadcast %236 : vector<1x8xf32> to vector<8x8xf32>
    %271 = arith.addf %269, %270 : vector<8x8xf32>
    %cst_110 = arith.constant dense<0xFF800000> : vector<8xf32>
    %272 = vector.multi_reduction <maximumf>, %271, %cst_110 [1] : vector<8x8xf32> to vector<8xf32>
    %273 = vector.shape_cast %272 : vector<8xf32> to vector<8x1xf32>
    %274 = vector.broadcast %273 : vector<8x1xf32> to vector<8x8xf32>
    %275 = arith.subf %271, %274 : vector<8x8xf32>
    %276 = math.exp %275 : vector<8x8xf32>
    %cst_111 = arith.constant dense<0.000000e+00> : vector<8xf32>
    %277 = vector.multi_reduction <add>, %276, %cst_111 [1] : vector<8x8xf32> to vector<8xf32>
    %278 = vector.shape_cast %277 : vector<8xf32> to vector<8x1xf32>
    %279 = tpu.reciprocal %278 {approx = true} : vector<8x1xf32> -> vector<8x1xf32>
    %280 = vector.broadcast %279 : vector<8x1xf32> to vector<8x8xf32>
    %281 = arith.mulf %276, %280 : vector<8x8xf32>
    %282 = arith.truncf %281 : vector<8x8xf32> to vector<8x8xbf16>
    %cst_112 = arith.constant dense<0.000000e+00> : vector<8x16xf32>
    %283 = tpu.matmul %282, %266, %cst_112 {dimension_numbers = #tpu.dot_dimension_numbers<[1], [0], [0], [1], [0, 0, 1, 1], [], []>} : vector<8x8xbf16>, vector<8x16xbf16>, vector<8x16xf32> -> vector<8x16xf32>
    %c0_113 = arith.constant 0 : index
    %c16_114 = arith.constant 16 : index
    %284 = vector.load %arg17[%c0_113, %c16_114] : memref<16x32xf32, #tpu.memory_space<vmem>>, vector<8x16xf32>
    tpu.vector_store %arg17[%c0_113, %c16_114], %283 {strides = array<i32>} : memref<16x32xf32, #tpu.memory_space<vmem>>, vector<8x16xf32>,
    %285 = vector.extract_strided_slice %27 {offsets = [1, 0], sizes = [1, 8], strides = [1, 1]} : vector<2x8xf32> to vector<1x8xf32>
    %286 = vector.extract_strided_slice %233 {offsets = [8, 0], sizes = [8, 16], strides = [1, 1]} : vector<16x32xf32> to vector<8x16xf32>
    %287 = arith.truncf %286 : vector<8x16xf32> to vector<8x16xbf16>
    %288 = vector.extract_strided_slice %234 {offsets = [8, 0], sizes = [8, 16], strides = [1, 1]} : vector<16x32xf32> to vector<8x16xf32>
    %289 = arith.truncf %288 : vector<8x16xf32> to vector<8x16xbf16>
    %290 = vector.extract_strided_slice %235 {offsets = [8, 0], sizes = [8, 16], strides = [1, 1]} : vector<16x32xf32> to vector<8x16xf32>
    %291 = arith.truncf %290 : vector<8x16xf32> to vector<8x16xbf16>
    %cst_115 = arith.constant dense<0.000000e+00> : vector<8x8xf32>
    %292 = tpu.matmul %287, %289, %cst_115 {dimension_numbers = #tpu.dot_dimension_numbers<[1], [1], [0], [0], [0, 0, 1, 0], [], []>} : vector<8x16xbf16>, vector<8x16xbf16>, vector<8x8xf32> -> vector<8x8xf32>
    %cst_116 = arith.constant 2.500000e-01 : f32
    %293 = vector.broadcast %cst_116 : f32 to vector<8x8xf32>
    %294 = arith.mulf %292, %293 : vector<8x8xf32>
    %295 = vector.broadcast %285 : vector<1x8xf32> to vector<8x8xf32>
    %296 = arith.addf %294, %295 : vector<8x8xf32>
    %cst_117 = arith.constant dense<0xFF800000> : vector<8xf32>
    %297 = vector.multi_reduction <maximumf>, %296, %cst_117 [1] : vector<8x8xf32> to vector<8xf32>
    %298 = vector.shape_cast %297 : vector<8xf32> to vector<8x1xf32>
    %299 = vector.broadcast %298 : vector<8x1xf32> to vector<8x8xf32>
    %300 = arith.subf %296, %299 : vector<8x8xf32>
    %301 = math.exp %300 : vector<8x8xf32>
    %cst_118 = arith.constant dense<0.000000e+00> : vector<8xf32>
    %302 = vector.multi_reduction <add>, %301, %cst_118 [1] : vector<8x8xf32> to vector<8xf32>
    %303 = vector.shape_cast %302 : vector<8xf32> to vector<8x1xf32>
    %304 = tpu.reciprocal %303 {approx = true} : vector<8x1xf32> -> vector<8x1xf32>
    %305 = vector.broadcast %304 : vector<8x1xf32> to vector<8x8xf32>
    %306 = arith.mulf %301, %305 : vector<8x8xf32>
    %307 = arith.truncf %306 : vector<8x8xf32> to vector<8x8xbf16>
    %cst_119 = arith.constant dense<0.000000e+00> : vector<8x16xf32>
    %308 = tpu.matmul %307, %291, %cst_119 {dimension_numbers = #tpu.dot_dimension_numbers<[1], [0], [0], [1], [0, 0, 1, 1], [], []>} : vector<8x8xbf16>, vector<8x16xbf16>, vector<8x16xf32> -> vector<8x16xf32>
    %c8_120 = arith.constant 8 : index
    %c0_121 = arith.constant 0 : index
    %309 = vector.load %arg17[%c8_120, %c0_121] : memref<16x32xf32, #tpu.memory_space<vmem>>, vector<8x16xf32>
    tpu.vector_store %arg17[%c8_120, %c0_121], %308 {strides = array<i32>} : memref<16x32xf32, #tpu.memory_space<vmem>>, vector<8x16xf32>,
    %310 = vector.extract_strided_slice %233 {offsets = [8, 16], sizes = [8, 16], strides = [1, 1]} : vector<16x32xf32> to vector<8x16xf32>
    %311 = arith.truncf %310 : vector<8x16xf32> to vector<8x16xbf16>
    %312 = vector.extract_strided_slice %234 {offsets = [8, 16], sizes = [8, 16], strides = [1, 1]} : vector<16x32xf32> to vector<8x16xf32>
    %313 = arith.truncf %312 : vector<8x16xf32> to vector<8x16xbf16>
    %314 = vector.extract_strided_slice %235 {offsets = [8, 16], sizes = [8, 16], strides = [1, 1]} : vector<16x32xf32> to vector<8x16xf32>
    %315 = arith.truncf %314 : vector<8x16xf32> to vector<8x16xbf16>
    %cst_122 = arith.constant dense<0.000000e+00> : vector<8x8xf32>
    %316 = tpu.matmul %311, %313, %cst_122 {dimension_numbers = #tpu.dot_dimension_numbers<[1], [1], [0], [0], [0, 0, 1, 0], [], []>} : vector<8x16xbf16>, vector<8x16xbf16>, vector<8x8xf32> -> vector<8x8xf32>
    %cst_123 = arith.constant 2.500000e-01 : f32
    %317 = vector.broadcast %cst_123 : f32 to vector<8x8xf32>
    %318 = arith.mulf %316, %317 : vector<8x8xf32>
    %319 = vector.broadcast %285 : vector<1x8xf32> to vector<8x8xf32>
    %320 = arith.addf %318, %319 : vector<8x8xf32>
    %cst_124 = arith.constant dense<0xFF800000> : vector<8xf32>
    %321 = vector.multi_reduction <maximumf>, %320, %cst_124 [1] : vector<8x8xf32> to vector<8xf32>
    %322 = vector.shape_cast %321 : vector<8xf32> to vector<8x1xf32>
    %323 = vector.broadcast %322 : vector<8x1xf32> to vector<8x8xf32>
    %324 = arith.subf %320, %323 : vector<8x8xf32>
    %325 = math.exp %324 : vector<8x8xf32>
    %cst_125 = arith.constant dense<0.000000e+00> : vector<8xf32>
    %326 = vector.multi_reduction <add>, %325, %cst_125 [1] : vector<8x8xf32> to vector<8xf32>
    %327 = vector.shape_cast %326 : vector<8xf32> to vector<8x1xf32>
    %328 = tpu.reciprocal %327 {approx = true} : vector<8x1xf32> -> vector<8x1xf32>
    %329 = vector.broadcast %328 : vector<8x1xf32> to vector<8x8xf32>
    %330 = arith.mulf %325, %329 : vector<8x8xf32>
    %331 = arith.truncf %330 : vector<8x8xf32> to vector<8x8xbf16>
    %cst_126 = arith.constant dense<0.000000e+00> : vector<8x16xf32>
    %332 = tpu.matmul %331, %315, %cst_126 {dimension_numbers = #tpu.dot_dimension_numbers<[1], [0], [0], [1], [0, 0, 1, 1], [], []>} : vector<8x8xbf16>, vector<8x16xbf16>, vector<8x16xf32> -> vector<8x16xf32>
    %c8_127 = arith.constant 8 : index
    %c16_128 = arith.constant 16 : index
    %333 = vector.load %arg17[%c8_127, %c16_128] : memref<16x32xf32, #tpu.memory_space<vmem>>, vector<8x16xf32>
    tpu.vector_store %arg17[%c8_127, %c16_128], %332 {strides = array<i32>} : memref<16x32xf32, #tpu.memory_space<vmem>>, vector<8x16xf32>,
    %c0_129 = arith.constant 0 : index
    %c0_130 = arith.constant 0 : index
    %334 = vector.load %arg17[%c0_129, %c0_130] : memref<16x32xf32, #tpu.memory_space<vmem>>, vector<16x32xf32>
    %c1_131 = arith.constant 1 : index
    %c0_132 = arith.constant 0 : index
    %c0_133 = arith.constant 0 : index
    %335 = vector.load %arg6[%c1_131, %c0_132, %c0_133] : memref<2x32x32xbf16, #tpu.memory_space<vmem>>, vector<1x32x32xbf16>
    %336 = vector.shape_cast %335 : vector<1x32x32xbf16> to vector<32x32xbf16>
    %337 = arith.truncf %334 : vector<16x32xf32> to vector<16x32xbf16>
    %cst_134 = arith.constant dense<0.000000e+00> : vector<16x32xf32>
    %338 = tpu.matmul %337, %336, %cst_134 {dimension_numbers = #tpu.dot_dimension_numbers<[1], [0], [0], [1], [0, 0, 1, 1], [], []>} : vector<16x32xbf16>, vector<32x32xbf16>, vector<16x32xf32> -> vector<16x32xf32>
    %c1_135 = arith.constant 1 : index
    %c0_136 = arith.constant 0 : index
    %c0_137 = arith.constant 0 : index
    %339 = vector.load %arg7[%c1_135, %c0_136, %c0_137] : memref<2x1x32xf32, #tpu.memory_space<vmem>>, vector<1x1x32xf32>
    %340 = vector.shape_cast %339 : vector<1x1x32xf32> to vector<1x32xf32>
    %341 = vector.broadcast %340 : vector<1x32xf32> to vector<16x32xf32>
    %342 = arith.addf %338, %341 : vector<16x32xf32>
    %343 = arith.addf %342, %224 : vector<16x32xf32>
    %c1_138 = arith.constant 1 : index
    %c0_139 = arith.constant 0 : index
    %c0_140 = arith.constant 0 : index
    %344 = vector.load %arg8[%c1_138, %c0_139, %c0_140] : memref<2x1x32xf32, #tpu.memory_space<vmem>>, vector<1x1x32xf32>
    %345 = vector.shape_cast %344 : vector<1x1x32xf32> to vector<1x32xf32>
    %c1_141 = arith.constant 1 : index
    %c0_142 = arith.constant 0 : index
    %c0_143 = arith.constant 0 : index
    %346 = vector.load %arg9[%c1_141, %c0_142, %c0_143] : memref<2x1x32xf32, #tpu.memory_space<vmem>>, vector<1x1x32xf32>
    %347 = vector.shape_cast %346 : vector<1x1x32xf32> to vector<1x32xf32>
    %cst_144 = arith.constant dense<0.000000e+00> : vector<16xf32>
    %348 = vector.multi_reduction <add>, %343, %cst_144 [1] : vector<16x32xf32> to vector<16xf32>
    %349 = vector.shape_cast %348 : vector<16xf32> to vector<16x1xf32>
    %cst_145 = arith.constant 3.200000e+01 : f32
    %350 = vector.broadcast %cst_145 : f32 to vector<16x1xf32>
    %351 = arith.divf %349, %350 : vector<16x1xf32>
    %352 = vector.broadcast %351 : vector<16x1xf32> to vector<16x32xf32>
    %353 = arith.subf %343, %352 : vector<16x32xf32>
    %354 = arith.mulf %353, %353 : vector<16x32xf32>
    %cst_146 = arith.constant dense<0.000000e+00> : vector<16xf32>
    %355 = vector.multi_reduction <add>, %354, %cst_146 [1] : vector<16x32xf32> to vector<16xf32>
    %356 = vector.shape_cast %355 : vector<16xf32> to vector<16x1xf32>
    %cst_147 = arith.constant 3.200000e+01 : f32
    %357 = vector.broadcast %cst_147 : f32 to vector<16x1xf32>
    %358 = arith.divf %356, %357 : vector<16x1xf32>
    %cst_148 = arith.constant 9.99999996E-13 : f32
    %359 = vector.broadcast %cst_148 : f32 to vector<16x1xf32>
    %360 = arith.addf %358, %359 : vector<16x1xf32>
    %361 = math.rsqrt %360 : vector<16x1xf32>
    %362 = vector.broadcast %361 : vector<16x1xf32> to vector<16x32xf32>
    %363 = arith.mulf %353, %362 : vector<16x32xf32>
    %364 = vector.broadcast %345 : vector<1x32xf32> to vector<16x32xf32>
    %365 = arith.mulf %363, %364 : vector<16x32xf32>
    %366 = vector.broadcast %347 : vector<1x32xf32> to vector<16x32xf32>
    %367 = arith.addf %365, %366 : vector<16x32xf32>
    %c1_149 = arith.constant 1 : index
    %c0_150 = arith.constant 0 : index
    %c0_151 = arith.constant 0 : index
    %368 = vector.load %arg10[%c1_149, %c0_150, %c0_151] : memref<2x32x64xbf16, #tpu.memory_space<vmem>>, vector<1x32x64xbf16>
    %369 = vector.shape_cast %368 : vector<1x32x64xbf16> to vector<32x64xbf16>
    %370 = arith.truncf %367 : vector<16x32xf32> to vector<16x32xbf16>
    %cst_152 = arith.constant dense<0.000000e+00> : vector<16x64xf32>
    %371 = tpu.matmul %370, %369, %cst_152 {dimension_numbers = #tpu.dot_dimension_numbers<[1], [0], [0], [1], [0, 0, 1, 1], [], []>} : vector<16x32xbf16>, vector<32x64xbf16>, vector<16x64xf32> -> vector<16x64xf32>
    %c1_153 = arith.constant 1 : index
    %c0_154 = arith.constant 0 : index
    %c0_155 = arith.constant 0 : index
    %372 = vector.load %arg11[%c1_153, %c0_154, %c0_155] : memref<2x1x64xf32, #tpu.memory_space<vmem>>, vector<1x1x64xf32>
    %373 = vector.shape_cast %372 : vector<1x1x64xf32> to vector<1x64xf32>
    %374 = vector.broadcast %373 : vector<1x64xf32> to vector<16x64xf32>
    %375 = arith.addf %371, %374 : vector<16x64xf32>
    %cst_156 = arith.constant 5.000000e-01 : f32
    %376 = vector.broadcast %cst_156 : f32 to vector<16x64xf32>
    %377 = arith.mulf %376, %375 : vector<16x64xf32>
    %cst_157 = arith.constant 4.471500e-02 : f32
    %378 = vector.broadcast %cst_157 : f32 to vector<16x64xf32>
    %379 = arith.mulf %378, %375 : vector<16x64xf32>
    %380 = arith.mulf %379, %375 : vector<16x64xf32>
    %381 = arith.mulf %380, %375 : vector<16x64xf32>
    %382 = arith.addf %375, %381 : vector<16x64xf32>
    %cst_158 = arith.constant 0.797884583 : f32
    %383 = vector.broadcast %cst_158 : f32 to vector<16x64xf32>
    %384 = arith.mulf %383, %382 : vector<16x64xf32>
    %385 = math.tanh %384 : vector<16x64xf32>
    %cst_159 = arith.constant 1.000000e+00 : f32
    %386 = vector.broadcast %cst_159 : f32 to vector<16x64xf32>
    %387 = arith.addf %386, %385 : vector<16x64xf32>
    %388 = arith.mulf %377, %387 : vector<16x64xf32>
    %c1_160 = arith.constant 1 : index
    %c0_161 = arith.constant 0 : index
    %c0_162 = arith.constant 0 : index
    %389 = vector.load %arg12[%c1_160, %c0_161, %c0_162] : memref<2x64x32xbf16, #tpu.memory_space<vmem>>, vector<1x64x32xbf16>
    %390 = vector.shape_cast %389 : vector<1x64x32xbf16> to vector<64x32xbf16>
    %391 = arith.truncf %388 : vector<16x64xf32> to vector<16x64xbf16>
    %cst_163 = arith.constant dense<0.000000e+00> : vector<16x32xf32>
    %392 = tpu.matmul %391, %390, %cst_163 {dimension_numbers = #tpu.dot_dimension_numbers<[1], [0], [0], [1], [0, 0, 1, 1], [], []>} : vector<16x64xbf16>, vector<64x32xbf16>, vector<16x32xf32> -> vector<16x32xf32>
    %c1_164 = arith.constant 1 : index
    %c0_165 = arith.constant 0 : index
    %c0_166 = arith.constant 0 : index
    %393 = vector.load %arg13[%c1_164, %c0_165, %c0_166] : memref<2x1x32xf32, #tpu.memory_space<vmem>>, vector<1x1x32xf32>
    %394 = vector.shape_cast %393 : vector<1x1x32xf32> to vector<1x32xf32>
    %395 = vector.broadcast %394 : vector<1x32xf32> to vector<16x32xf32>
    %396 = arith.addf %392, %395 : vector<16x32xf32>
    %397 = arith.addf %396, %367 : vector<16x32xf32>
    %c1_167 = arith.constant 1 : index
    %c0_168 = arith.constant 0 : index
    %c0_169 = arith.constant 0 : index
    %398 = vector.load %arg14[%c1_167, %c0_168, %c0_169] : memref<2x1x32xf32, #tpu.memory_space<vmem>>, vector<1x1x32xf32>
    %399 = vector.shape_cast %398 : vector<1x1x32xf32> to vector<1x32xf32>
    %c1_170 = arith.constant 1 : index
    %c0_171 = arith.constant 0 : index
    %c0_172 = arith.constant 0 : index
    %400 = vector.load %arg15[%c1_170, %c0_171, %c0_172] : memref<2x1x32xf32, #tpu.memory_space<vmem>>, vector<1x1x32xf32>
    %401 = vector.shape_cast %400 : vector<1x1x32xf32> to vector<1x32xf32>
    %cst_173 = arith.constant dense<0.000000e+00> : vector<16xf32>
    %402 = vector.multi_reduction <add>, %397, %cst_173 [1] : vector<16x32xf32> to vector<16xf32>
    %403 = vector.shape_cast %402 : vector<16xf32> to vector<16x1xf32>
    %cst_174 = arith.constant 3.200000e+01 : f32
    %404 = vector.broadcast %cst_174 : f32 to vector<16x1xf32>
    %405 = arith.divf %403, %404 : vector<16x1xf32>
    %406 = vector.broadcast %405 : vector<16x1xf32> to vector<16x32xf32>
    %407 = arith.subf %397, %406 : vector<16x32xf32>
    %408 = arith.mulf %407, %407 : vector<16x32xf32>
    %cst_175 = arith.constant dense<0.000000e+00> : vector<16xf32>
    %409 = vector.multi_reduction <add>, %408, %cst_175 [1] : vector<16x32xf32> to vector<16xf32>
    %410 = vector.shape_cast %409 : vector<16xf32> to vector<16x1xf32>
    %cst_176 = arith.constant 3.200000e+01 : f32
    %411 = vector.broadcast %cst_176 : f32 to vector<16x1xf32>
    %412 = arith.divf %410, %411 : vector<16x1xf32>
    %cst_177 = arith.constant 9.99999996E-13 : f32
    %413 = vector.broadcast %cst_177 : f32 to vector<16x1xf32>
    %414 = arith.addf %412, %413 : vector<16x1xf32>
    %415 = math.rsqrt %414 : vector<16x1xf32>
    %416 = vector.broadcast %415 : vector<16x1xf32> to vector<16x32xf32>
    %417 = arith.mulf %407, %416 : vector<16x32xf32>
    %418 = vector.broadcast %399 : vector<1x32xf32> to vector<16x32xf32>
    %419 = arith.mulf %417, %418 : vector<16x32xf32>
    %420 = vector.broadcast %401 : vector<1x32xf32> to vector<16x32xf32>
    %421 = arith.addf %419, %420 : vector<16x32xf32>
    %c0_178 = arith.constant 0 : index
    %c0_179 = arith.constant 0 : index
    %422 = vector.load %arg16[%c0_178, %c0_179] : memref<16x32xf32, #tpu.memory_space<vmem>>, vector<16x32xf32>
    tpu.vector_store %arg16[%c0_178, %c0_179], %421 {strides = array<i32>} : memref<16x32xf32, #tpu.memory_space<vmem>>, vector<16x32xf32>,
    return
  }
}

</mosaic_0001>

<bundles_post_ra>
// kernel: bert_forward.1
= control target key start
LH: loop header
LB: loop body
LE: loop exit
PB: predicated region body
PF: predicated region fallthrough
CT: control target
= control target key end

     0   :  { %s2787_s0 = inlined_call_operand.vmem [shape: f32[16,32], index: 0, kind: input, shape index: {}]   ;;  %s2788_s1 = inlined_call_operand.vmem [shape: f32[2,8], index: 1, kind: input, shape index: {}]   ;;  %s2789_s2 = inlined_call_operand.vmem [shape: f32[1,32], index: 2, kind: input, shape index: {}]   ;;  %s2790_s3 = inlined_call_operand.vmem [shape: f32[1,32], index: 3, kind: input, shape index: {}]   ;;  %s2791_s4 = inlined_call_operand.vmem [shape: bf16[2,32,96], index: 4, kind: input, shape index: {}]   ;;  %s2792_s5 = inlined_call_operand.vmem [shape: f32[2,1,96], index: 5, kind: input, shape index: {}]   ;;  %s2793_s6 = inlined_call_operand.vmem [shape: bf16[2,32,32], index: 6, kind: input, shape index: {}]   ;;  %s2794_s7 = inlined_call_operand.vmem [shape: f32[2,1,32], index: 7, kind: input, shape index: {}]   ;;  %s2795_s8 = inlined_call_operand.vmem [shape: f32[2,1,32], index: 8, kind: input, shape index: {}]   ;;  %s2796_s9 = inlined_call_operand.vmem [shape: f32[2,1,32], index: 9, kind: input, shape index: {}]   ;;  %s2797_s10 = inlined_call_operand.vmem [shape: bf16[2,32,64], index: 10, kind: input, shape index: {}]   ;;  %s2798_s11 = inlined_call_operand.vmem [shape: f32[2,1,64], index: 11, kind: input, shape index: {}]   ;;  %s2799_s12 = inlined_call_operand.vmem [shape: bf16[2,64,32], index: 12, kind: input, shape index: {}]   ;;  %s2800_s13 = inlined_call_operand.vmem [shape: f32[2,1,32], index: 13, kind: input, shape index: {}]   ;;  %s2801_s14 = inlined_call_operand.vmem [shape: f32[2,1,32], index: 14, kind: input, shape index: {}]   ;;  %s2802_s15 = inlined_call_operand.vmem [shape: f32[2,1,32], index: 15, kind: input, shape index: {}]   ;;  %s2803_s16 = inlined_call_operand.hbm [shape: f32[16,32], index: 16, kind: output, shape index: {}]  }
   0x1   :  { %2805 = sst [smem:[#allocation6_spill]] %s2787_s0 }
   0x2   :  { %s2806_s23 = sld [smem:[#allocation6_spill]]  ;;  %vm59_vm0 = vcmask 261120  }
   0x8   :  { %v55_v0 = vld [vmem:[%s2806_s23] sm:$0xff]  ;;  %v56_v1 = vld [vmem:[%s2806_s23 + $0x8] sm:$0xff] }
   0x9   :  { %v60_v2 = vsel %vm59_vm0, %v55_v0, 0.0  ;;  %v63_v3 = vsel %vm59_vm0, %v56_v1, 0.0 }
   0xa   :  { %61 = vadd.xlane.f32.xlu0 %v60_v2 }
   0xe   :  { %64 = vadd.xlane.f32.xlu0 %v63_v3 }
   0xf   :  { %21 = vsyncpa [#allocation4], 0  ;;  %v2198_v14 = vld [vmem:[%s2791_s4] sm:$0xff]   ;;  %v2302_v15 = vmov 0.0   ;;  %v2199_v16 = vld [vmem:[%s2791_s4 + $0x8] sm:$0xff]   ;;  %vm2303_vm1 = vmmov 0   ;;  %v226_v53 = vlaneseq }
  0x10   :  { %2019 = vmatprep.subr.bf16.mxu1 %v2302_v15  ;;  %2033 = vmatprep.subr.bf16.mxu0 %v2302_v15  ;;  %v1869_v25 = vld [vmem:[%s2789_s2] ss:$0 sm:$0xff]  ;;  %s2305_s20 = smov 96   ;;  %s2306_s21 = smov 112   ;;  %vm178_vm2 = vcmask 130048   ;;  %vm231_vm3 = vcmask 64512  }
  0x11   :  { %2020 = vmatpush3.bf16.msra.mxu1 %v2198_v14  ;;  %2023 = vmatprep.mubr.msk.bf16.mxu1 %vm2303_vm1, %v2302_v15  ;;  %v1870_v29 = vld [vmem:[%s2790_s3] ss:$0 sm:$0xff]  ;;  %s2304_s3 = smov 80   ;;  %v227_v56 = vshrl.u32 %v226_v53, 7  ;;  %s2308_s24 = smov 64   ;;  %vm249_vm4 = vcmask 1043456  }
  0x12   :  { %2021 = vmatprep.subr.bf16.mxu1 %v2302_v15  ;;  %2035 = vmatprep.mubr.msk.bf16.mxu0 %vm2303_vm1, %v2302_v15  ;;  %v1871_v34 = vld [vmem:[%s2792_s5] ss:$0 sm:$0xff]  ;;  %s2309_s25 = smov 16   ;;  %vm410_vm5 = vcmask 261248   ;;  %vm888_vm6 = vcmask 523264  }
  0x13   :  { %v103_v54 = vld [vmem:[%s2788_s1] sm:$0x3]  ;;  %v228_v58 = vsub.s32 0, %v227_v56  ;;  %s2307_s1 = smov 48  }
  0x14   :  { %v104_v55 = vsub.f32 1.0, %v103_v54 }
  0x15   :  { %2022 = vmatpush3.bf16.msra.mxu1 %v2199_v16 }
  0x16   :  { %2027 = vmatprep.subr.bf16.mxu1 %v2302_v15  ;;  %v105_v57 = vmul.f32 -10000.0, %v104_v55 }
  0x18   :  { %v2481_v59 = vrot.slane %v105_v57, %v228_v58 }
  0x97   :  { %v62_v4 = vpop.xlane.xlu0 %61 }
  0x98   :  { %v67_v5 = vmul.f32 0.03125, %v62_v4 }
  0x9a   :  { %v69_v6 = vsub.f32 %v55_v0, %v67_v5 }
  0x9b   :  { %v65_v7 = vpop.xlane.xlu0 %64 }
  0x9c   :  { %v68_v8 = vmul.f32 0.03125, %v65_v7  ;;  %v71_v9 = vmul.f32 %v69_v6, %v69_v6 }
  0x9e   :  { %v70_v10 = vsub.f32 %v56_v1, %v68_v8  ;;  %v73_v11 = vsel %vm59_vm0, %v71_v9, 0.0  ;;  %v465_v9 = vsub.s32 1, %v227_v56 }
  0x9f   :  { %74 = vadd.xlane.f32.xlu1 %v73_v11 }
  0xa0   :  { %v72_v12 = vmul.f32 %v70_v10, %v70_v10  ;;  %v2487_v11 = vrot.slane %v105_v57, %v465_v9 }
  0xa2   :  { %v76_v13 = vsel %vm59_vm0, %v72_v12, 0.0 }
  0xa3   :  { %77 = vadd.xlane.f32.xlu1 %v76_v13 }
 0x12c   :  { %v75_v17 = vpop.xlane.xlu1 %74 }
 0x12d   :  { %v79_v18 = vmul.f32 0.03125, %v75_v17 }
 0x12f   :  { %v81_v19 = vadd.f32 1e-12, %v79_v18 }
 0x130   :  { %v78_v20 = vpop.xlane.xlu1 %77 }
 0x131   :  { %2218 = vrsqrt.f32 %v81_v19  ;;  %v80_v21 = vmul.f32 0.03125, %v78_v20 }
 0x133   :  { %v82_v22 = vadd.f32 1e-12, %v80_v21 }
 0x135   :  { %2220 = vrsqrt.f32 %v82_v22 }
 0x13b   :  { %v2219_v23 = vpop.eup %2218 }
 0x13c   :  { %v85_v24 = vmul.f32 %v2219_v23, %v69_v6 }
 0x13e   :  { %v93_v28 = vmul.f32 %v1869_v25, %v85_v24 }
 0x13f   :  { %v2221_v26 = vpop.eup %2220 }
 0x140   :  { %v86_v27 = vmul.f32 %v2221_v26, %v70_v10  ;;  %v2428_v31 = vadd.f32 %v1870_v29, %v93_v28 }
 0x142   :  { %v94_v30 = vmul.f32 %v1869_v25, %v86_v27 }
 0x144   :  { %v2430_v32 = vadd.f32 %v1870_v29, %v94_v30 }
 0x146   :  { %v110_v33 = vpack.c.bf16 %v2430_v32, %v2428_v31 }
 0x148   :  { %2024 = vmatmul.mubr.msk.bf16.vlgmr.msra.gmra.mrb[0].mxu1 %vm59_vm0, %v110_v33 }
 0x149   :  { %2029 = vmatprep.mubr.msk.bf16.mxu1 %vm2303_vm1, %v2302_v15 }
 0x21b   :  { %v167_v35 = vpop.f32.mrb[0].mxu1 }
 0x21c   :  { %v168_v36 = vadd.f32 %v1871_v34, %v167_v35  ;;  %v2025_v37 = vpop.f32.mrb[1].mxu1 }
 0x21d   :  { %v170_v38 = vpop.f32.mrb[2].mxu1 }
 0x21e   :  { %v2440_v39 = vpack.c.bf16 %v168_v36, %v168_v36  ;;  %v171_v40 = vadd.f32 %v1871_v34, %v170_v38  ;;  %v2026_v41 = vpop.f32.mrb[3].mxu1 }
 0x220   :  { %296 = vrot.lane.b32.xlu1 %v2440_v39, %s2304_s3  ;;  %176 = vrot.lane.b32.xlu0 %v2440_v39, %s2305_s20  ;;  %v2446_v42 = vpack.c.bf16 %v171_v40, %v171_v40 }
 0x224   :  { %294 = vrot.lane.b32.xlu1 %v2440_v39, %s2306_s21  ;;  %531 = vrot.lane.b32.xlu0 %v2446_v42, %s2304_s3 }
 0x228   :  { %414 = vrot.lane.b32.xlu1 %v2446_v42, %s2305_s20 }
 0x22c   :  { %529 = vrot.lane.b32.xlu1 %v2446_v42, %s2306_s21 }
 0x292   :  { %v177_v43 = vpop.permute.xlu0 %176  ;;  %v297_v45 = vpop.permute.xlu1 %296 }
 0x293   :  { %v183_v44 = vsel %vm178_vm2, %v177_v43, 0  ;;  %v302_v47 = vsel %vm178_vm2, %v297_v45, 0 }
 0x294   :  { %2028 = vmatpush3.bf16.xpose.msra.mxu1 %v183_v44 }
 0x295   :  { %2039 = vmatprep.subr.bf16.mxu1 %v2302_v15 }
 0x296   :  { %v295_v46 = vpop.permute.xlu1 %294  ;;  %v532_v50 = vpop.permute.xlu0 %531 }
 0x297   :  { %v537_v51 = vsel %vm178_vm2, %v532_v50, 0 }
 0x29a   :  { %v415_v48 = vpop.permute.xlu1 %414 }
 0x29b   :  { %2030 = vmatmul.mubr.msk.bf16.vlgmr.msra.gmra.mrb[4].mxu1 %vm178_vm2, %v2440_v39  ;;  %v420_v49 = vsel %vm178_vm2, %v415_v48, 0 }
 0x29c   :  { %2040 = vmatpush3.bf16.xpose.msra.mxu1 %v302_v47  ;;  %2041 = vmatprep.mubr.msk.bf16.mxu1 %vm2303_vm1, %v2302_v15 }
 0x29d   :  { %2051 = vmatprep.subr.bf16.mxu1 %v2302_v15 }
 0x29e   :  { %v530_v52 = vpop.permute.xlu1 %529 }
 0x2a3   :  { %2042 = vmatmul.mubr.msk.bf16.vlgmr.msra.gmra.mrb[8].mxu1 %vm178_vm2, %v295_v46 }
 0x2a4   :  { %2052 = vmatpush3.bf16.xpose.msra.mxu1 %v420_v49  ;;  %2053 = vmatprep.mubr.msk.bf16.mxu1 %vm2303_vm1, %v2302_v15 }
 0x2a5   :  { %2063 = vmatprep.subr.bf16.mxu1 %v2302_v15 }
 0x2ab   :  { %2054 = vmatmul.mubr.msk.bf16.vlgmr.msra.gmra.mrb[12].mxu1 %vm178_vm2, %v2446_v42 }
 0x2ac   :  { %2064 = vmatpush3.bf16.xpose.msra.mxu1 %v537_v51  ;;  %2065 = vmatprep.mubr.msk.bf16.mxu1 %vm2303_vm1, %v2302_v15 }
 0x2ad   :  { %2075 = vmatprep.subr.bf16.mxu1 %v2302_v15 }
 0x2b3   :  { %2066 = vmatmul.mubr.msk.bf16.vlgmr.msra.gmra.mrb[16].mxu1 %vm178_vm2, %v530_v52 }
 0x2b4   :  { %2079 = vmatprep.mubr.msk.bf16.mxu1 %vm2303_vm1, %v2302_v15 }
 0x36e   :  { %v219_v60 = vpop.f32.mrb[4].mxu1 }
 0x36f   :  { %v225_v61 = vmul.f32 0.25, %v219_v60  ;;  %v2031_v62 = vpop.f32.mrb[5].mxu1 }
 0x370   :  { %v222_v63 = vpop.f32.mrb[6].mxu1 }
 0x371   :  { %v2032_v0 = vpop.f32.mrb[7].mxu1  ;;  %v230_v1 = vadd.f32 %v2481_v59, %v225_v61 }
 0x373   :  { %v232_v2 = vsel %vm231_vm3, %v230_v1, -inf }
 0x374   :  { %233 = vmax.xlane.f32.xlu0 %v232_v2 }
 0x376   :  { %v338_v3 = vpop.f32.mrb[8].mxu1 }
 0x377   :  { %v344_v4 = vmul.f32 0.25, %v338_v3  ;;  %v2043_v5 = vpop.f32.mrb[9].mxu1 }
 0x378   :  { %v341_v6 = vpop.f32.mrb[10].mxu1 }
 0x379   :  { %v2044_v7 = vpop.f32.mrb[11].mxu1  ;;  %v345_v8 = vadd.f32 %v344_v4, %v2481_v59 }
 0x37b   :  { %v346_v10 = vsel %vm231_vm3, %v345_v8, -inf }
 0x37c   :  { %347 = vmax.xlane.f32.xlu1 %v346_v10 }
 0x37e   :  { %v456_v12 = vpop.f32.mrb[12].mxu1 }
 0x37f   :  { %v462_v13 = vmul.f32 0.25, %v456_v12  ;;  %v2055_v14 = vpop.f32.mrb[13].mxu1 }
 0x380   :  { %v459_v16 = vpop.f32.mrb[14].mxu1 }
 0x381   :  { %v2056_v17 = vpop.f32.mrb[15].mxu1  ;;  %v467_v18 = vadd.f32 %v2487_v11, %v462_v13 }
 0x383   :  { %v468_v19 = vsel %vm231_vm3, %v467_v18, -inf }
 0x384   :  { %469 = vmax.xlane.f32.xlu0 %v468_v19 }
 0x386   :  { %v573_v20 = vpop.f32.mrb[16].mxu1 }
 0x387   :  { %v579_v21 = vmul.f32 0.25, %v573_v20  ;;  %v2067_v22 = vpop.f32.mrb[17].mxu1 }
 0x388   :  { %v576_v23 = vpop.f32.mrb[18].mxu1 }
 0x389   :  { %v2068_v24 = vpop.f32.mrb[19].mxu1  ;;  %v580_v25 = vadd.f32 %v579_v21, %v2487_v11 }
 0x38a   :  { %v2200_v24 = vld [vmem:[%s2793_s6] sm:$0xff]  }
 0x38b   :  { %v581_v26 = vsel %vm231_vm3, %v580_v25, -inf  ;;  %2076 = vmatpush3.bf16.msra.mxu1 %v2200_v24 }
 0x38c   :  { %582 = vmax.xlane.f32.xlu0 %v581_v26  ;;  %2077 = vmatprep.subr.bf16.mxu1 %v2302_v15 }
 0x401   :  { %v234_v27 = vpop.xlane.xlu0 %233 }
 0x402   :  { %v235_v28 = vsub.f32 %v230_v1, %v234_v27 }
 0x404   :  { %v236_v29 = vmul.f32 1.442695, %v235_v28 }
 0x406   :  { %2222 = vpow2.f32 %v236_v29 }
 0x409   :  { %v348_v30 = vpop.xlane.xlu1 %347 }
 0x40a   :  { %v349_v33 = vsub.f32 %v345_v8, %v348_v30 }
 0x40c   :  { %v350_v34 = vmul.f32 1.442695, %v349_v33 }
 0x40e   :  { %2224 = vpow2.f32 %v350_v34 }
 0x410   :  { %v2223_v35 = vpop.eup %2222 }
 0x411   :  { %v470_v36 = vpop.xlane.xlu0 %469  ;;  %v238_v37 = vsel %vm231_vm3, %v2223_v35, 0.0 }
 0x412   :  { %v471_v38 = vsub.f32 %v467_v18, %v470_v36  ;;  %239 = vadd.xlane.f32.xlu0 %v238_v37  ;;  %v1883_v37 = vld [vmem:[%s2794_s7] ss:$0 sm:$0xff] }
 0x414   :  { %v472_v40 = vmul.f32 1.442695, %v471_v38 }
 0x416   :  { %2226 = vpow2.f32 %v472_v40 }
 0x418   :  { %v2225_v41 = vpop.eup %2224 }
 0x419   :  { %v352_v43 = vsel %vm231_vm3, %v2225_v41, 0.0  ;;  %v583_v46 = vpop.xlane.xlu0 %582 }
 0x41a   :  { %353 = vadd.xlane.f32.xlu1 %v352_v43  ;;  %v584_v47 = vsub.f32 %v580_v25, %v583_v46  ;;  %v2201_v25 = vld [vmem:[%s2793_s6 + $0x8] sm:$0xff]  }
 0x41b   :  { %2078 = vmatpush3.bf16.msra.mxu1 %v2201_v25 }
 0x41c   :  { %v585_v48 = vmul.f32 1.442695, %v584_v47  ;;  %2091 = vmatprep.subr.bf16.mxu1 %v2302_v15 }
 0x41e   :  { %2228 = vpow2.f32 %v585_v48 }
 0x420   :  { %v2227_v44 = vpop.eup %2226 }
 0x421   :  { %v474_v45 = vsel %vm231_vm3, %v2227_v44, 0.0 }
 0x422   :  { %475 = vadd.xlane.f32.xlu0 %v474_v45 }
 0x428   :  { %v2229_v49 = vpop.eup %2228 }
 0x429   :  { %v587_v50 = vsel %vm231_vm3, %v2229_v49, 0.0 }
 0x42b   :  { %358 = vrot.lane.b32.xlu1 %v2440_v39, %s2307_s1 }
 0x42f   :  { %480 = vrot.lane.b32.xlu1 %v2446_v42, %s2308_s24 }
 0x438   :  { %244 = vrot.lane.b32.xlu0 %v2440_v39, %s2308_s24 }
 0x453   :  { %588 = vadd.xlane.f32.xlu1 %v587_v50 }
 0x464   :  { %593 = vrot.lane.b32.xlu1 %v2446_v42, %s2307_s1 }
 0x49f   :  { %v240_v51 = vpop.xlane.xlu0 %239 }
 0x4a0   :  { %2230 = vrcp.f32 %v240_v51 }
 0x4a7   :  { %v354_v52 = vpop.xlane.xlu1 %353 }
 0x4a8   :  { %2232 = vrcp.f32 %v354_v52 }
 0x4aa   :  { %v2231_v53 = vpop.eup %2230 }
 0x4ab   :  { %v242_v55 = vmul.f32 %v2231_v53, %v2223_v35  ;;  %v359_v57 = vpop.permute.xlu1 %358 }
 0x4ac   :  { %v364_v42 = vsel %vm249_vm4, %v359_v57, 0 }
 0x4ad   :  { %v243_v58 = vpack.c.bf16 %v242_v55, %v242_v55 }
 0x4af   :  { %v476_v54 = vpop.xlane.xlu0 %475  ;;  %v481_v62 = vpop.permute.xlu1 %480 }
 0x4b0   :  { %2234 = vrcp.f32 %v476_v54  ;;  %v486_v1 = vsel %vm249_vm4, %v481_v62, 0 }
 0x4b2   :  { %v2233_v60 = vpop.eup %2232 }
 0x4b3   :  { %v245_v39 = vpop.permute.xlu0 %244  ;;  %v356_v61 = vmul.f32 %v2233_v60, %v2225_v41 }
 0x4b4   :  { %v251_v56 = vsel %vm249_vm4, %v245_v39, 0 }
 0x4b5   :  { %2034 = vmatpush3.bf16.msra.mxu0 %v251_v56  ;;  %v357_v63 = vpack.c.bf16 %v356_v61, %v356_v61 }
 0x4b6   :  { %2045 = vmatprep.subr.bf16.mxu0 %v2302_v15 }
 0x4b8   :  { %2036 = vmatmul.mubr.msk.bf16.vlgmr.msra.gmra.mrb[0].mxu0 %vm231_vm3, %v243_v58  ;;  %v2203_v58 = vld [vmem:[%s2797_s10 + $0x8] sm:$0xff]  }
 0x4b9   :  { %2046 = vmatpush3.bf16.msra.mxu0 %v364_v42  ;;  %2047 = vmatprep.mubr.msk.bf16.mxu0 %vm2303_vm1, %v2302_v15 }
 0x4ba   :  { %2057 = vmatprep.subr.bf16.mxu0 %v2302_v15  ;;  %v2235_v0 = vpop.eup %2234 }
 0x4bb   :  { %v478_v2 = vmul.f32 %v2235_v0, %v2227_v44 }
 0x4bd   :  { %v479_v3 = vpack.c.bf16 %v478_v2, %v478_v2 }
 0x4c0   :  { %2048 = vmatmul.mubr.msk.bf16.vlgmr.msra.gmra.mrb[4].mxu0 %vm231_vm3, %v357_v63 }
 0x4c1   :  { %2058 = vmatpush3.bf16.msra.mxu0 %v486_v1  ;;  %2059 = vmatprep.mubr.msk.bf16.mxu0 %vm2303_vm1, %v2302_v15 }
 0x4c2   :  { %2069 = vmatprep.subr.bf16.mxu0 %v2302_v15 }
 0x4c8   :  { %2060 = vmatmul.mubr.msk.bf16.vlgmr.msra.gmra.mrb[8].mxu0 %vm231_vm3, %v479_v3  ;;  %v1887_v3 = vld [vmem:[%s2795_s8] ss:$0 sm:$0xff] }
 0x4c9   :  { %2071 = vmatprep.mubr.msk.bf16.mxu0 %vm2303_vm1, %v2302_v15 }
 0x4e0   :  { %v589_v4 = vpop.xlane.xlu1 %588 }
 0x4e1   :  { %2236 = vrcp.f32 %v589_v4 }
 0x4e4   :  { %v594_v5 = vpop.permute.xlu1 %593 }
 0x4e5   :  { %v599_v6 = vsel %vm249_vm4, %v594_v5, 0 }
 0x4e6   :  { %2070 = vmatpush3.bf16.msra.mxu0 %v599_v6 }
 0x4e7   :  { %2083 = vmatprep.subr.bf16.mxu0 %v2302_v15 }
 0x4eb   :  { %v2237_v7 = vpop.eup %2236 }
 0x4ec   :  { %v591_v8 = vmul.f32 %v2237_v7, %v2229_v49  ;;  %v1888_v7 = vld [vmem:[%s2796_s9] ss:$0 sm:$0xff] }
 0x4ee   :  { %v592_v9 = vpack.c.bf16 %v591_v8, %v591_v8 }
 0x4f0   :  { %2072 = vmatmul.mubr.msk.bf16.vlgmr.msra.gmra.mrb[12].mxu0 %vm231_vm3, %v592_v9 }
 0x4f1   :  { %2087 = vmatprep.mubr.msk.bf16.mxu0 %vm2303_vm1, %v2302_v15 }
 0x58b   :  { %v287_v10 = vpop.f32.mrb[0].mxu0 }
 0x58c   :  { %293 = vst.msk [vmem:[#allocation2] sm:$0xff] %vm178_vm2, %v287_v10  ;;  %v2037_v12 = vpop.f32.mrb[1].mxu0 }
 0x58d   :  { %v290_v13 = vpop.f32.mrb[2].mxu0 }
 0x58e   :  { %v2038_v14 = vpop.f32.mrb[3].mxu0  ;;  %v2204_v13 = vld [vmem:[%s2799_s12] sm:$0xff]  }
 0x58f   :  { %v2205_v14 = vld [vmem:[%s2799_s12 + $0x8] sm:$0xff]  }
 0x593   :  { %v400_v16 = vpop.f32.mrb[4].mxu0 }
 0x594   :  { %407 = vrot.lane.b32.xlu0 %v400_v16, %s2309_s25  ;;  %v2049_v17 = vpop.f32.mrb[5].mxu0  ;;  %v2206_v16 = vld [vmem:[%s2799_s12 + $0x10] sm:$0xff]  }
 0x595   :  { %v403_v18 = vpop.f32.mrb[6].mxu0  ;;  %v2207_v17 = vld [vmem:[%s2799_s12 + $0x18] sm:$0xff]  }
 0x596   :  { %v2050_v19 = vpop.f32.mrb[7].mxu0  ;;  %v1889_v18 = vld [vmem:[%s2798_s11] ss:$0 sm:$0xff] }
 0x59b   :  { %v522_v20 = vpop.f32.mrb[8].mxu0 }
 0x59c   :  { %528 = vst.msk [vmem:[#allocation2 + $0x8] sm:$0xff] %vm178_vm2, %v522_v20  ;;  %v2061_v21 = vpop.f32.mrb[9].mxu0 }
 0x59d   :  { %v525_v22 = vpop.f32.mrb[10].mxu0 }
 0x59e   :  { %v2062_v23 = vpop.f32.mrb[11].mxu0 }
 0x5c3   :  { %v635_v26 = vpop.f32.mrb[12].mxu0 }
 0x5c4   :  { %642 = vrot.lane.b32.xlu1 %v635_v26, %s2309_s25  ;;  %v2073_v27 = vpop.f32.mrb[13].mxu0 }
 0x5c5   :  { %v638_v28 = vpop.f32.mrb[14].mxu0 }
 0x5c6   :  { %v2074_v29 = vpop.f32.mrb[15].mxu0 }
 0x606   :  { %v408_v30 = vpop.permute.xlu0 %407 }
 0x607   :  { %411 = vst.msk [vmem:[#allocation2] sm:$0xff] %vm410_vm5, %v408_v30 }
 0x60e   :  { %v646_v34 = vld [vmem:[#allocation2] sm:$0xff] }
 0x636   :  { %v643_v33 = vpop.permute.xlu1 %642 }
 0x637   :  { %645 = vst.msk [vmem:[#allocation2 + $0x8] sm:$0xff] %vm410_vm5, %v643_v33 }
 0x63e   :  { %v647_v35 = vld [vmem:[#allocation2 + $0x8] sm:$0xff] }
 0x63f   :  { %v652_v36 = vpack.c.bf16 %v647_v35, %v646_v34 }
 0x641   :  { %2080 = vmatmul.mubr.msk.bf16.vlgmr.msra.gmra.mrb[20].mxu1 %vm59_vm0, %v652_v36 }
 0x642   :  { %2099 = vmatprep.mubr.msk.bf16.mxu1 %vm2303_vm1, %v2302_v15  ;;  %2092 = vmatpush3.bf16.msra.mxu1 %v2204_v13 }
 0x643   :  { %2093 = vmatprep.subr.bf16.mxu1 %v2302_v15 }
 0x646   :  { %2094 = vmatpush3.bf16.msra.mxu1 %v2205_v14 }
 0x647   :  { %2095 = vmatprep.subr.bf16.mxu1 %v2302_v15 }
 0x64a   :  { %2096 = vmatpush3.bf16.msra.mxu1 %v2206_v16 }
 0x64b   :  { %2097 = vmatprep.subr.bf16.mxu1 %v2302_v15 }
 0x64e   :  { %2098 = vmatpush3.bf16.msra.mxu1 %v2207_v17 }
 0x64f   :  { %2117 = vmatprep.subr.bf16.mxu1 %v2302_v15 }
 0x714   :  { %v709_v38 = vpop.f32.mrb[20].mxu1 }
 0x715   :  { %v710_v40 = vadd.f32 %v1883_v37, %v709_v38  ;;  %v2081_v41 = vpop.f32.mrb[21].mxu1 }
 0x716   :  { %v712_v43 = vpop.f32.mrb[22].mxu1 }
 0x717   :  { %v713_v44 = vadd.f32 %v1883_v37, %v712_v43  ;;  %v2082_v45 = vpop.f32.mrb[23].mxu1  ;;  %v716_v46 = vadd.f32 %v710_v40, %v2428_v31 }
 0x719   :  { %v720_v47 = vsel %vm59_vm0, %v716_v46, 0.0  ;;  %v717_v48 = vadd.f32 %v713_v44, %v2430_v32  ;;  %v2202_v32 = vld [vmem:[%s2797_s10] sm:$0xff]  }
 0x71a   :  { %721 = vadd.xlane.f32.xlu0 %v720_v47  ;;  %2084 = vmatpush3.bf16.msra.mxu0 %v2202_v32 }
 0x71b   :  { %v723_v49 = vsel %vm59_vm0, %v717_v48, 0.0  ;;  %2085 = vmatprep.subr.bf16.mxu0 %v2302_v15 }
 0x71c   :  { %724 = vadd.xlane.f32.xlu1 %v723_v49 }
 0x71e   :  { %2086 = vmatpush3.bf16.msra.mxu0 %v2203_v58 }
 0x71f   :  { %2103 = vmatprep.subr.bf16.mxu0 %v2302_v15 }
 0x7a7   :  { %v722_v50 = vpop.xlane.xlu0 %721 }
 0x7a8   :  { %v726_v51 = vmul.f32 0.03125, %v722_v50 }
 0x7a9   :  { %v725_v52 = vpop.xlane.xlu1 %724 }
 0x7aa   :  { %v728_v53 = vsub.f32 %v716_v46, %v726_v51  ;;  %v727_v54 = vmul.f32 0.03125, %v725_v52 }
 0x7ac   :  { %v729_v55 = vsub.f32 %v717_v48, %v727_v54  ;;  %v730_v39 = vmul.f32 %v728_v53, %v728_v53  ;;  %v1893_v48 = vld [vmem:[%s2800_s13] ss:$0 sm:$0xff] }
 0x7ae   :  { %v732_v56 = vsel %vm59_vm0, %v730_v39, 0.0  ;;  %v731_v57 = vmul.f32 %v729_v55, %v729_v55 }
 0x7af   :  { %733 = vadd.xlane.f32.xlu0 %v732_v56 }
 0x7b0   :  { %v735_v31 = vsel %vm59_vm0, %v731_v57, 0.0 }
 0x7b3   :  { %736 = vadd.xlane.f32.xlu0 %v735_v31 }
 0x83c   :  { %v734_v60 = vpop.xlane.xlu0 %733 }
 0x83d   :  { %v738_v42 = vmul.f32 0.03125, %v734_v60 }
 0x83f   :  { %v740_v61 = vadd.f32 1e-12, %v738_v42 }
 0x840   :  { %v737_v62 = vpop.xlane.xlu0 %736 }
 0x841   :  { %2238 = vrsqrt.f32 %v740_v61  ;;  %v739_v63 = vmul.f32 0.03125, %v737_v62 }
 0x843   :  { %v741_v0 = vadd.f32 1e-12, %v739_v63 }
 0x845   :  { %2240 = vrsqrt.f32 %v741_v0 }
 0x84b   :  { %v2239_v1 = vpop.eup %2238 }
 0x84c   :  { %v744_v2 = vmul.f32 %v2239_v1, %v728_v53 }
 0x84e   :  { %v752_v5 = vmul.f32 %v1887_v3, %v744_v2  ;;  %v2208_v2 = vld [vmem:[%s2791_s4 + $0x10] sm:$0xff]  }
 0x84f   :  { %v2241_v4 = vpop.eup %2240 }
 0x850   :  { %v745_v6 = vmul.f32 %v2241_v4, %v729_v55  ;;  %v760_v9 = vadd.f32 %v1888_v7, %v752_v5 }
 0x852   :  { %v753_v8 = vmul.f32 %v1887_v3, %v745_v6  ;;  %v2209_v3 = vld [vmem:[%s2791_s4 + $0x18] sm:$0xff]  }
 0x854   :  { %v761_v10 = vadd.f32 %v1888_v7, %v753_v8 }
 0x856   :  { %v766_v12 = vpack.c.bf16 %v761_v10, %v760_v9 }
 0x858   :  { %2088 = vmatmul.mubr.msk.bf16.vlgmr.msra.gmra.mrb[16].mxu0 %vm59_vm0, %v766_v12  ;;  %v1899_v12 = vld [vmem:[%s2801_s14] ss:$0 sm:$0xff] }
 0x859   :  { %2107 = vmatprep.mubr.msk.bf16.mxu0 %vm2303_vm1, %v2302_v15  ;;  %2104 = vmatpush3.bf16.msra.mxu0 %v2208_v2 }
 0x85a   :  { %2105 = vmatprep.subr.bf16.mxu0 %v2302_v15 }
 0x85d   :  { %2106 = vmatpush3.bf16.msra.mxu0 %v2209_v3 }
 0x85e   :  { %2111 = vmatprep.subr.bf16.mxu0 %v2302_v15 }
 0x92b   :  { %v823_v19 = vpop.f32.mrb[16].mxu0 }
 0x92c   :  { %v824_v20 = vadd.f32 %v1889_v18, %v823_v19  ;;  %v2089_v21 = vpop.f32.mrb[17].mxu0 }
 0x92d   :  { %v826_v22 = vpop.f32.mrb[18].mxu0 }
 0x92e   :  { %v832_v23 = vmul.f32 0.044715, %v824_v20  ;;  %v827_v24 = vadd.f32 %v1889_v18, %v826_v22  ;;  %v2090_v25 = vpop.f32.mrb[19].mxu0  ;;  %v830_v41 = vmul.f32 0.5, %v824_v20  ;;  %v1900_v18 = vld [vmem:[%s2802_s15] ss:$0 sm:$0xff] }
 0x930   :  { %v834_v26 = vmul.f32 %v832_v23, %v824_v20  ;;  %v833_v27 = vmul.f32 0.044715, %v827_v24  ;;  %v831_v43 = vmul.f32 0.5, %v827_v24  ;;  %v1906_v23 = vld [vmem:[%s2792_s5 + $0x1] ss:$0 sm:$0xff] }
 0x932   :  { %v836_v28 = vmul.f32 %v834_v26, %v824_v20  ;;  %v835_v29 = vmul.f32 %v833_v27, %v827_v24 }
 0x934   :  { %v838_v30 = vadd.f32 %v836_v28, %v824_v20  ;;  %v837_v33 = vmul.f32 %v835_v29, %v827_v24 }
 0x936   :  { %v840_v34 = vmul.f32 0.7978846, %v838_v30  ;;  %v839_v35 = vadd.f32 %v837_v33, %v827_v24 }
 0x938   :  { %2242 = vtanh.f32 %v840_v34  ;;  %v841_v36 = vmul.f32 0.7978846, %v839_v35 }
 0x93a   :  { %2244 = vtanh.f32 %v841_v36 }
 0x942   :  { %v2243_v37 = vpop.eup %2242 }
 0x943   :  { %v844_v38 = vadd.f32 1.0, %v2243_v37 }
 0x944   :  { %v2245_v40 = vpop.eup %2244 }
 0x945   :  { %v845_v44 = vadd.f32 1.0, %v2245_v40  ;;  %v846_v45 = vmul.f32 %v844_v38, %v830_v41 }
 0x947   :  { %v847_v46 = vmul.f32 %v845_v44, %v831_v43 }
 0x949   :  { %v856_v47 = vpack.c.bf16 %v847_v46, %v846_v45 }
 0x94b   :  { %2100 = vmatmul.mubr.msk.bf16.vlgmr.msra.gmra.mrb[24].mxu1 %vm888_vm6, %v856_v47 }
 0x94c   :  { %2119 = vmatprep.mubr.msk.bf16.mxu1 %vm2303_vm1, %v2302_v15 }
 0xa1e   :  { %v926_v49 = vpop.f32.mrb[24].mxu1 }
 0xa1f   :  { %v927_v50 = vadd.f32 %v1893_v48, %v926_v49  ;;  %v2101_v51 = vpop.f32.mrb[25].mxu1 }
 0xa20   :  { %v929_v52 = vpop.f32.mrb[26].mxu1 }
 0xa21   :  { %v930_v53 = vadd.f32 %v1893_v48, %v929_v52  ;;  %v2102_v54 = vpop.f32.mrb[27].mxu1  ;;  %v933_v55 = vadd.f32 %v927_v50, %v760_v9 }
 0xa23   :  { %v937_v39 = vsel %vm59_vm0, %v933_v55, 0.0  ;;  %v934_v56 = vadd.f32 %v930_v53, %v761_v10 }
 0xa24   :  { %938 = vadd.xlane.f32.xlu0 %v937_v39 }
 0xa25   :  { %v940_v57 = vsel %vm59_vm0, %v934_v56, 0.0 }
 0xa26   :  { %941 = vadd.xlane.f32.xlu1 %v940_v57 }
 0xab1   :  { %v939_v31 = vpop.xlane.xlu0 %938 }
 0xab2   :  { %v943_v32 = vmul.f32 0.03125, %v939_v31 }
 0xab3   :  { %v942_v58 = vpop.xlane.xlu1 %941 }
 0xab4   :  { %v945_v60 = vsub.f32 %v933_v55, %v943_v32  ;;  %v944_v42 = vmul.f32 0.03125, %v942_v58 }
 0xab6   :  { %v946_v61 = vsub.f32 %v934_v56, %v944_v42  ;;  %v947_v62 = vmul.f32 %v945_v60, %v945_v60 }
 0xab8   :  { %v949_v63 = vsel %vm59_vm0, %v947_v62, 0.0  ;;  %v948_v0 = vmul.f32 %v946_v61, %v946_v61 }
 0xab9   :  { %950 = vadd.xlane.f32.xlu0 %v949_v63 }
 0xaba   :  { %v952_v1 = vsel %vm59_vm0, %v948_v0, 0.0 }
 0xabb   :  { %953 = vadd.xlane.f32.xlu1 %v952_v1 }
 0xb46   :  { %v951_v4 = vpop.xlane.xlu0 %950 }
 0xb47   :  { %v955_v5 = vmul.f32 0.03125, %v951_v4 }
 0xb48   :  { %v954_v6 = vpop.xlane.xlu1 %953 }
 0xb49   :  { %v957_v7 = vadd.f32 1e-12, %v955_v5  ;;  %v956_v8 = vmul.f32 0.03125, %v954_v6 }
 0xb4b   :  { %2246 = vrsqrt.f32 %v957_v7  ;;  %v958_v9 = vadd.f32 1e-12, %v956_v8 }
 0xb4d   :  { %2248 = vrsqrt.f32 %v958_v9 }
 0xb55   :  { %v2247_v10 = vpop.eup %2246 }
 0xb56   :  { %v961_v13 = vmul.f32 %v2247_v10, %v945_v60 }
 0xb57   :  { %v2249_v14 = vpop.eup %2248 }
 0xb58   :  { %v969_v16 = vmul.f32 %v1899_v12, %v961_v13  ;;  %v962_v17 = vmul.f32 %v2249_v14, %v946_v61 }
 0xb5a   :  { %v970_v19 = vmul.f32 %v1899_v12, %v962_v17  ;;  %v2611_v20 = vadd.f32 %v1900_v18, %v969_v16 }
 0xb5c   :  { %v2613_v21 = vadd.f32 %v1900_v18, %v970_v19 }
 0xb5e   :  { %v984_v22 = vpack.c.bf16 %v2613_v21, %v2611_v20 }
 0xb60   :  { %2108 = vmatmul.mubr.msk.bf16.vlgmr.msra.gmra.mrb[20].mxu0 %vm59_vm0, %v984_v22 }
 0xb61   :  { %2113 = vmatprep.mubr.msk.bf16.mxu0 %vm2303_vm1, %v2302_v15 }
 0xc33   :  { %v1042_v24 = vpop.f32.mrb[20].mxu0 }
 0xc34   :  { %v1043_v25 = vadd.f32 %v1906_v23, %v1042_v24  ;;  %v2109_v26 = vpop.f32.mrb[21].mxu0 }
 0xc35   :  { %v1045_v27 = vpop.f32.mrb[22].mxu0 }
 0xc36   :  { %v2623_v28 = vpack.c.bf16 %v1043_v25, %v1043_v25  ;;  %v1046_v29 = vadd.f32 %v1906_v23, %v1045_v27  ;;  %v2110_v30 = vpop.f32.mrb[23].mxu0 }
 0xc38   :  { %1164 = vrot.lane.b32.xlu1 %v2623_v28, %s2304_s3  ;;  %1051 = vrot.lane.b32.xlu0 %v2623_v28, %s2305_s20  ;;  %v2629_v33 = vpack.c.bf16 %v1046_v29, %v1046_v29 }
 0xc3c   :  { %1162 = vrot.lane.b32.xlu1 %v2623_v28, %s2306_s21  ;;  %1394 = vrot.lane.b32.xlu0 %v2629_v33, %s2304_s3 }
 0xc40   :  { %1281 = vrot.lane.b32.xlu1 %v2629_v33, %s2305_s20  ;;  %s2310_s20 = smov [#allocation3]  }
 0xc44   :  { %1392 = vrot.lane.b32.xlu1 %v2629_v33, %s2306_s21  ;;  %s1858_s21 = sshll.u32 %s2310_s20, 4  ;;  %s1859_s21 = int_to_ptr.vmem [resolvable:$true] %s1858_s21 }
 0xc45   :  { %p2283_p1 = scmp.lt.s32.totalorder %s1859_s21, %s1859_s21 }
 0xcaa   :  { %v1052_v34 = vpop.permute.xlu0 %1051  ;;  %v1165_v36 = vpop.permute.xlu1 %1164 }
 0xcab   :  { %v1057_v35 = vsel %vm178_vm2, %v1052_v34, 0  ;;  %v1170_v38 = vsel %vm178_vm2, %v1165_v36, 0 }
 0xcac   :  { %2112 = vmatpush3.bf16.xpose.msra.mxu0 %v1057_v35 }
 0xcad   :  { %2123 = vmatprep.subr.bf16.mxu0 %v2302_v15 }
 0xcae   :  { %v1163_v37 = vpop.permute.xlu1 %1162  ;;  %v1395_v43 = vpop.permute.xlu0 %1394 }
 0xcaf   :  { %v1400_v44 = vsel %vm178_vm2, %v1395_v43, 0 }
 0xcb2   :  { %v1282_v40 = vpop.permute.xlu1 %1281 }
 0xcb3   :  { %2114 = vmatmul.mubr.msk.bf16.vlgmr.msra.gmra.mrb[24].mxu0 %vm178_vm2, %v2623_v28  ;;  %v1287_v41 = vsel %vm178_vm2, %v1282_v40, 0 }
 0xcb4   :  { %2124 = vmatpush3.bf16.xpose.msra.mxu0 %v1170_v38  ;;  %2125 = vmatprep.mubr.msk.bf16.mxu0 %vm2303_vm1, %v2302_v15 }
 0xcb5   :  { %2135 = vmatprep.subr.bf16.mxu0 %v2302_v15 }
 0xcb6   :  { %v1393_v45 = vpop.permute.xlu1 %1392 }
 0xcbb   :  { %2126 = vmatmul.mubr.msk.bf16.vlgmr.msra.gmra.mrb[28].mxu0 %vm178_vm2, %v1163_v37 }
 0xcbc   :  { %2136 = vmatpush3.bf16.xpose.msra.mxu0 %v1287_v41  ;;  %2137 = vmatprep.mubr.msk.bf16.mxu0 %vm2303_vm1, %v2302_v15 }
 0xcbd   :  { %2147 = vmatprep.subr.bf16.mxu0 %v2302_v15 }
 0xcc3   :  { %2138 = vmatmul.mubr.msk.bf16.vlgmr.msra.gmra.mrb[32].mxu0 %vm178_vm2, %v2629_v33 }
 0xcc4   :  { %2148 = vmatpush3.bf16.xpose.msra.mxu0 %v1400_v44  ;;  %2149 = vmatprep.mubr.msk.bf16.mxu0 %vm2303_vm1, %v2302_v15 }
 0xcc5   :  { %2159 = vmatprep.subr.bf16.mxu0 %v2302_v15 }
 0xccb   :  { %2150 = vmatmul.mubr.msk.bf16.vlgmr.msra.gmra.mrb[36].mxu0 %vm178_vm2, %v1393_v45 }
 0xccc   :  { %2163 = vmatprep.mubr.msk.bf16.mxu0 %vm2303_vm1, %v2302_v15 }
 0xd86   :  { %v1093_v46 = vpop.f32.mrb[24].mxu0 }
 0xd87   :  { %v1099_v47 = vmul.f32 0.25, %v1093_v46  ;;  %v2115_v48 = vpop.f32.mrb[25].mxu0 }
 0xd88   :  { %v1096_v49 = vpop.f32.mrb[26].mxu0 }
 0xd89   :  { %v2116_v50 = vpop.f32.mrb[27].mxu0  ;;  %v1100_v51 = vadd.f32 %v1099_v47, %v2481_v59 }
 0xd8b   :  { %v1101_v52 = vsel %vm231_vm3, %v1100_v51, -inf }
 0xd8c   :  { %1102 = vmax.xlane.f32.xlu0 %v1101_v52 }
 0xd8e   :  { %v1206_v53 = vpop.f32.mrb[28].mxu0 }
 0xd8f   :  { %v1212_v54 = vmul.f32 0.25, %v1206_v53  ;;  %v2127_v55 = vpop.f32.mrb[29].mxu0 }
 0xd90   :  { %v1209_v39 = vpop.f32.mrb[30].mxu0 }
 0xd91   :  { %v2128_v56 = vpop.f32.mrb[31].mxu0  ;;  %v1213_v57 = vadd.f32 %v1212_v54, %v2481_v59 }
 0xd93   :  { %v1214_v31 = vsel %vm231_vm3, %v1213_v57, -inf }
 0xd94   :  { %1215 = vmax.xlane.f32.xlu1 %v1214_v31 }
 0xd96   :  { %v1323_v32 = vpop.f32.mrb[32].mxu0 }
 0xd97   :  { %v1329_v58 = vmul.f32 0.25, %v1323_v32  ;;  %v2139_v60 = vpop.f32.mrb[33].mxu0 }
 0xd98   :  { %v1326_v42 = vpop.f32.mrb[34].mxu0 }
 0xd99   :  { %v2140_v61 = vpop.f32.mrb[35].mxu0  ;;  %v1330_v62 = vadd.f32 %v1329_v58, %v2487_v11 }
 0xd9b   :  { %v1331_v63 = vsel %vm231_vm3, %v1330_v62, -inf }
 0xd9c   :  { %1332 = vmax.xlane.f32.xlu0 %v1331_v63 }
 0xd9e   :  { %v1436_v0 = vpop.f32.mrb[36].mxu0 }
 0xd9f   :  { %v1442_v1 = vmul.f32 0.25, %v1436_v0  ;;  %v2151_v2 = vpop.f32.mrb[37].mxu0 }
 0xda0   :  { %v1439_v3 = vpop.f32.mrb[38].mxu0  ;;  %v2210_v2 = vld [vmem:[%s2793_s6 + $0x10] sm:$0xff]  }
 0xda1   :  { %v2152_v4 = vpop.f32.mrb[39].mxu0  ;;  %v1443_v59 = vadd.f32 %v1442_v1, %v2487_v11  ;;  %2160 = vmatpush3.bf16.msra.mxu0 %v2210_v2  ;;  %v2211_v3 = vld [vmem:[%s2793_s6 + $0x18] sm:$0xff]   ;;  %s2278_s6 = scalar_lea.vmem %s1859_s21, 256 }
 0xda2   :  { %2161 = vmatprep.subr.bf16.mxu0 %v2302_v15  ;;  %p2279_p0 = scmp.ne.s32.totalorder %s1859_s21, %s2278_s6  ;;  %p2284_p2 = scmp.lt.s32.totalorder %s2278_s6, %s2278_s6 }
 0xda3   :  { %v1444_v5 = vsel %vm231_vm3, %v1443_v59, -inf }
 0xda4   :  { %1445 = vmax.xlane.f32.xlu0 %v1444_v5  ;;  %p2285_p3 = por %p2284_p2, %p2283_p1 }
 0xda5   :  { %2162 = vmatpush3.bf16.msra.mxu0 %v2211_v3 }
 0xda6   :  { %2175 = vmatprep.subr.bf16.mxu0 %v2302_v15  ;;  %p2286_p4 = pnand %p2285_p3, %p2279_p0 }
 0xe19   :  { %v1103_v6 = vpop.xlane.xlu0 %1102 }
 0xe1a   :  { %v1104_v7 = vsub.f32 %v1100_v51, %v1103_v6 }
 0xe1c   :  { %v1105_v8 = vmul.f32 1.442695, %v1104_v7 }
 0xe1e   :  { %2250 = vpow2.f32 %v1105_v8 }
 0xe21   :  { %v1216_v9 = vpop.xlane.xlu1 %1215 }
 0xe22   :  { %v1217_v10 = vsub.f32 %v1213_v57, %v1216_v9 }
 0xe24   :  { %v1218_v12 = vmul.f32 1.442695, %v1217_v10 }
 0xe26   :  { %2252 = vpow2.f32 %v1218_v12 }
 0xe28   :  { %v2251_v13 = vpop.eup %2250 }
 0xe29   :  { %v1333_v14 = vpop.xlane.xlu0 %1332  ;;  %v1107_v16 = vsel %vm231_vm3, %v2251_v13, 0.0 }
 0xe2a   :  { %v1334_v17 = vsub.f32 %v1330_v62, %v1333_v14  ;;  %1108 = vadd.xlane.f32.xlu0 %v1107_v16 }
 0xe2c   :  { %v1335_v18 = vmul.f32 1.442695, %v1334_v17 }
 0xe2e   :  { %2254 = vpow2.f32 %v1335_v18 }
 0xe30   :  { %v2253_v11 = vpop.eup %2252 }
 0xe31   :  { %v1220_v19 = vsel %vm231_vm3, %v2253_v11, 0.0  ;;  %v1446_v24 = vpop.xlane.xlu0 %1445 }
 0xe32   :  { %1221 = vadd.xlane.f32.xlu1 %v1220_v19  ;;  %v1447_v25 = vsub.f32 %v1443_v59, %v1446_v24 }
 0xe34   :  { %v1448_v26 = vmul.f32 1.442695, %v1447_v25 }
 0xe36   :  { %2256 = vpow2.f32 %v1448_v26 }
 0xe38   :  { %v2255_v22 = vpop.eup %2254 }
 0xe39   :  { %v1337_v23 = vsel %vm231_vm3, %v2255_v22, 0.0 }
 0xe3a   :  { %1338 = vadd.xlane.f32.xlu0 %v1337_v23 }
 0xe40   :  { %v2257_v27 = vpop.eup %2256 }
 0xe41   :  { %v1450_v29 = vsel %vm231_vm3, %v2257_v27, 0.0 }
 0xe43   :  { %1226 = vrot.lane.b32.xlu1 %v2623_v28, %s2307_s1 }
 0xe47   :  { %1343 = vrot.lane.b32.xlu1 %v2629_v33, %s2308_s24 }
 0xe50   :  { %1113 = vrot.lane.b32.xlu0 %v2623_v28, %s2308_s24 }
 0xe6b   :  { %1451 = vadd.xlane.f32.xlu1 %v1450_v29 }
 0xe7c   :  { %1456 = vrot.lane.b32.xlu1 %v2629_v33, %s2307_s1 }
 0xeb7   :  { %v1109_v30 = vpop.xlane.xlu0 %1108 }
 0xeb8   :  { %2258 = vrcp.f32 %v1109_v30 }
 0xebf   :  { %v1222_v34 = vpop.xlane.xlu1 %1221 }
 0xec0   :  { %2260 = vrcp.f32 %v1222_v34 }
 0xec2   :  { %v2259_v35 = vpop.eup %2258 }
 0xec3   :  { %v1111_v37 = vmul.f32 %v2259_v35, %v2251_v13  ;;  %v1227_v40 = vpop.permute.xlu1 %1226  ;;  %v1923_v13 = vld [vmem:[%s2794_s7 + $0x1] ss:$0 sm:$0xff] }
 0xec4   :  { %v1232_v44 = vsel %vm249_vm4, %v1227_v40, 0 }
 0xec5   :  { %v1112_v41 = vpack.c.bf16 %v1111_v37, %v1111_v37 }
 0xec7   :  { %v1339_v36 = vpop.xlane.xlu0 %1338  ;;  %v1344_v45 = vpop.permute.xlu1 %1343 }
 0xec8   :  { %2262 = vrcp.f32 %v1339_v36  ;;  %v1349_v48 = vsel %vm249_vm4, %v1344_v45, 0 }
 0xeca   :  { %v2261_v43 = vpop.eup %2260 }
 0xecb   :  { %v1114_v38 = vpop.permute.xlu0 %1113  ;;  %v1224_v33 = vmul.f32 %v2261_v43, %v2253_v11 }
 0xecc   :  { %v1119_v28 = vsel %vm249_vm4, %v1114_v38, 0 }
 0xecd   :  { %2118 = vmatpush3.bf16.msra.mxu1 %v1119_v28  ;;  %v1225_v46 = vpack.c.bf16 %v1224_v33, %v1224_v33  ;;  %v2213_v28 = vld [vmem:[%s2797_s10 + $0x18] sm:$0xff]  }
 0xece   :  { %2129 = vmatprep.subr.bf16.mxu1 %v2302_v15 }
 0xed0   :  { %2120 = vmatmul.mubr.msk.bf16.vlgmr.msra.gmra.mrb[28].mxu1 %vm231_vm3, %v1112_v41 }
 0xed1   :  { %2130 = vmatpush3.bf16.msra.mxu1 %v1232_v44  ;;  %2131 = vmatprep.mubr.msk.bf16.mxu1 %vm2303_vm1, %v2302_v15 }
 0xed2   :  { %2141 = vmatprep.subr.bf16.mxu1 %v2302_v15  ;;  %v2263_v47 = vpop.eup %2262 }
 0xed3   :  { %v1341_v49 = vmul.f32 %v2263_v47, %v2255_v22 }
 0xed5   :  { %v1342_v50 = vpack.c.bf16 %v1341_v49, %v1341_v49 }
 0xed8   :  { %2132 = vmatmul.mubr.msk.bf16.vlgmr.msra.gmra.mrb[32].mxu1 %vm231_vm3, %v1225_v46 }
 0xed9   :  { %2142 = vmatpush3.bf16.msra.mxu1 %v1349_v48  ;;  %2143 = vmatprep.mubr.msk.bf16.mxu1 %vm2303_vm1, %v2302_v15  ;;  %v1929_v48 = vld [vmem:[%s2795_s8 + $0x1] ss:$0 sm:$0xff] }
 0xeda   :  { %2153 = vmatprep.subr.bf16.mxu1 %v2302_v15 }
 0xee0   :  { %2144 = vmatmul.mubr.msk.bf16.vlgmr.msra.gmra.mrb[36].mxu1 %vm231_vm3, %v1342_v50 }
 0xee1   :  { %2155 = vmatprep.mubr.msk.bf16.mxu1 %vm2303_vm1, %v2302_v15 }
 0xef8   :  { %v1452_v51 = vpop.xlane.xlu1 %1451 }
 0xef9   :  { %2264 = vrcp.f32 %v1452_v51 }
 0xefc   :  { %v1457_v52 = vpop.permute.xlu1 %1456 }
 0xefd   :  { %v1462_v53 = vsel %vm249_vm4, %v1457_v52, 0  ;;  %v1930_v52 = vld [vmem:[%s2796_s9 + $0x1] ss:$0 sm:$0xff] }
 0xefe   :  { %2154 = vmatpush3.bf16.msra.mxu1 %v1462_v53 }
 0xeff   :  { %2167 = vmatprep.subr.bf16.mxu1 %v2302_v15 }
 0xf03   :  { %v2265_v54 = vpop.eup %2264 }
 0xf04   :  { %v1454_v55 = vmul.f32 %v2265_v54, %v2257_v27 }
 0xf06   :  { %v1455_v39 = vpack.c.bf16 %v1454_v55, %v1454_v55 }
 0xf08   :  { %2156 = vmatmul.mubr.msk.bf16.vlgmr.msra.gmra.mrb[40].mxu1 %vm231_vm3, %v1455_v39 }
 0xf09   :  { %2171 = vmatprep.mubr.msk.bf16.mxu1 %vm2303_vm1, %v2302_v15 }
 0xfa3   :  { %v1155_v56 = vpop.f32.mrb[28].mxu1 }
 0xfa4   :  { %1161 = vst.msk [vmem:[#allocation2] sm:$0xff] %vm178_vm2, %v1155_v56  ;;  %v2121_v57 = vpop.f32.mrb[29].mxu1  ;;  %v2214_v56 = vld [vmem:[%s2799_s12 + $0x20] sm:$0xff]  }
 0xfa5   :  { %v1158_v31 = vpop.f32.mrb[30].mxu1  ;;  %v2215_v57 = vld [vmem:[%s2799_s12 + $0x28] sm:$0xff]  }
 0xfa6   :  { %v2122_v32 = vpop.f32.mrb[31].mxu1  ;;  %v2216_v31 = vld [vmem:[%s2799_s12 + $0x30] sm:$0xff]  }
 0xfa7   :  { %v2217_v32 = vld [vmem:[%s2799_s12 + $0x38] sm:$0xff]  }
 0xfab   :  { %v1268_v58 = vpop.f32.mrb[32].mxu1 }
 0xfac   :  { %1275 = vrot.lane.b32.xlu0 %v1268_v58, %s2309_s25  ;;  %v2133_v60 = vpop.f32.mrb[33].mxu1  ;;  %v1936_v58 = vld [vmem:[%s2798_s11 + $0x1] ss:$0 sm:$0xff] }
 0xfad   :  { %v1271_v42 = vpop.f32.mrb[34].mxu1 }
 0xfae   :  { %v2134_v61 = vpop.f32.mrb[35].mxu1 }
 0xfb3   :  { %v1385_v62 = vpop.f32.mrb[36].mxu1 }
 0xfb4   :  { %1391 = vst.msk [vmem:[#allocation2 + $0x8] sm:$0xff] %vm178_vm2, %v1385_v62  ;;  %v2145_v63 = vpop.f32.mrb[37].mxu1 }
 0xfb5   :  { %v1388_v0 = vpop.f32.mrb[38].mxu1 }
 0xfb6   :  { %v2146_v1 = vpop.f32.mrb[39].mxu1 }
 0xfdb   :  { %v1498_v4 = vpop.f32.mrb[40].mxu1 }
 0xfdc   :  { %1505 = vrot.lane.b32.xlu1 %v1498_v4, %s2309_s25  ;;  %v2157_v59 = vpop.f32.mrb[41].mxu1 }
 0xfdd   :  { %v1501_v5 = vpop.f32.mrb[42].mxu1 }
 0xfde   :  { %v2158_v6 = vpop.f32.mrb[43].mxu1 }
0x101e   :  { %v1276_v7 = vpop.permute.xlu0 %1275 }
0x101f   :  { %1278 = vst.msk [vmem:[#allocation2] sm:$0xff] %vm410_vm5, %v1276_v7 }
0x1026   :  { %v1509_v9 = vld [vmem:[#allocation2] sm:$0xff] }
0x104e   :  { %v1506_v8 = vpop.permute.xlu1 %1505 }
0x104f   :  { %1508 = vst.msk [vmem:[#allocation2 + $0x8] sm:$0xff] %vm410_vm5, %v1506_v8 }
0x1056   :  { %v1510_v10 = vld [vmem:[#allocation2 + $0x8] sm:$0xff] }
0x1057   :  { %v1516_v12 = vpack.c.bf16 %v1510_v10, %v1509_v9 }
0x1059   :  { %2164 = vmatmul.mubr.msk.bf16.vlgmr.msra.gmra.mrb[40].mxu0 %vm59_vm0, %v1516_v12 }
0x105a   :  { %2183 = vmatprep.mubr.msk.bf16.mxu0 %vm2303_vm1, %v2302_v15  ;;  %2176 = vmatpush3.bf16.msra.mxu0 %v2214_v56 }
0x105b   :  { %2177 = vmatprep.subr.bf16.mxu0 %v2302_v15 }
0x105e   :  { %2178 = vmatpush3.bf16.msra.mxu0 %v2215_v57 }
0x105f   :  { %2179 = vmatprep.subr.bf16.mxu0 %v2302_v15 }
0x1062   :  { %2180 = vmatpush3.bf16.msra.mxu0 %v2216_v31 }
0x1063   :  { %2181 = vmatprep.subr.bf16.mxu0 %v2302_v15 }
0x1066   :  { %2182 = vmatpush3.bf16.msra.mxu0 %v2217_v32 }
0x112c   :  { %v1574_v14 = vpop.f32.mrb[40].mxu0 }
0x112d   :  { %v1575_v16 = vadd.f32 %v1923_v13, %v1574_v14  ;;  %v2165_v17 = vpop.f32.mrb[41].mxu0 }
0x112e   :  { %v1577_v18 = vpop.f32.mrb[42].mxu0 }
0x112f   :  { %v1578_v11 = vadd.f32 %v1923_v13, %v1577_v18  ;;  %v2166_v19 = vpop.f32.mrb[43].mxu0  ;;  %v1581_v22 = vadd.f32 %v1575_v16, %v2611_v20 }
0x1130   :  { %v1949_v19 = vld [vmem:[%s2800_s13 + $0x1] ss:$0 sm:$0xff] }
0x1131   :  { %v1587_v23 = vsel %vm59_vm0, %v1581_v22, 0.0  ;;  %v1582_v24 = vadd.f32 %v1578_v11, %v2613_v21  ;;  %v2212_v21 = vld [vmem:[%s2797_s10 + $0x10] sm:$0xff]  }
0x1132   :  { %1588 = vadd.xlane.f32.xlu0 %v1587_v23  ;;  %2168 = vmatpush3.bf16.msra.mxu1 %v2212_v21 }
0x1133   :  { %v1590_v25 = vsel %vm59_vm0, %v1582_v24, 0.0  ;;  %2169 = vmatprep.subr.bf16.mxu1 %v2302_v15 }
0x1134   :  { %1591 = vadd.xlane.f32.xlu1 %v1590_v25 }
0x1136   :  { %2170 = vmatpush3.bf16.msra.mxu1 %v2213_v28 }
0x11bf   :  { %v1589_v26 = vpop.xlane.xlu0 %1588 }
0x11c0   :  { %v1593_v27 = vmul.f32 0.03125, %v1589_v26 }
0x11c1   :  { %v1592_v29 = vpop.xlane.xlu1 %1591 }
0x11c2   :  { %v1595_v30 = vsub.f32 %v1581_v22, %v1593_v27  ;;  %v1594_v34 = vmul.f32 0.03125, %v1592_v29 }
0x11c4   :  { %v1596_v35 = vsub.f32 %v1582_v24, %v1594_v34  ;;  %v1597_v36 = vmul.f32 %v1595_v30, %v1595_v30 }
0x11c6   :  { %v1599_v37 = vsel %vm59_vm0, %v1597_v36, 0.0  ;;  %v1598_v38 = vmul.f32 %v1596_v35, %v1596_v35 }
0x11c7   :  { %1600 = vadd.xlane.f32.xlu0 %v1599_v37 }
0x11c8   :  { %v1602_v20 = vsel %vm59_vm0, %v1598_v38, 0.0 }
0x11cb   :  { %1603 = vadd.xlane.f32.xlu0 %v1602_v20 }
0x1254   :  { %v1601_v40 = vpop.xlane.xlu0 %1600 }
0x1255   :  { %v1605_v41 = vmul.f32 0.03125, %v1601_v40 }
0x1257   :  { %v1607_v43 = vadd.f32 1e-12, %v1605_v41 }
0x1258   :  { %v1604_v44 = vpop.xlane.xlu0 %1603 }
0x1259   :  { %2266 = vrsqrt.f32 %v1607_v43  ;;  %v1606_v33 = vmul.f32 0.03125, %v1604_v44 }
0x125b   :  { %v1608_v45 = vadd.f32 1e-12, %v1606_v33 }
0x125d   :  { %2268 = vrsqrt.f32 %v1608_v45 }
0x1263   :  { %v2267_v46 = vpop.eup %2266 }
0x1264   :  { %v1611_v47 = vmul.f32 %v2267_v46, %v1595_v30 }
0x1266   :  { %v1619_v50 = vmul.f32 %v1929_v48, %v1611_v47 }
0x1267   :  { %v2269_v49 = vpop.eup %2268 }
0x1268   :  { %v1612_v51 = vmul.f32 %v2269_v49, %v1596_v35  ;;  %v1627_v54 = vadd.f32 %v1930_v52, %v1619_v50 }
0x126a   :  { %v1620_v53 = vmul.f32 %v1929_v48, %v1612_v51  ;;  %v1957_v51 = vld [vmem:[%s2801_s14 + $0x1] ss:$0 sm:$0xff] }
0x126c   :  { %v1628_v55 = vadd.f32 %v1930_v52, %v1620_v53 }
0x126e   :  { %v1634_v39 = vpack.c.bf16 %v1628_v55, %v1627_v54 }
0x1270   :  { %2172 = vmatmul.mubr.msk.bf16.vlgmr.msra.gmra.mrb[44].mxu1 %vm59_vm0, %v1634_v39 }
0x1343   :  { %v1692_v60 = vpop.f32.mrb[44].mxu1 }
0x1344   :  { %v1693_v42 = vadd.f32 %v1936_v58, %v1692_v60  ;;  %v2173_v61 = vpop.f32.mrb[45].mxu1 }
0x1345   :  { %v1695_v62 = vpop.f32.mrb[46].mxu1 }
0x1346   :  { %v1701_v63 = vmul.f32 0.044715, %v1693_v42  ;;  %v1696_v0 = vadd.f32 %v1936_v58, %v1695_v62  ;;  %v2174_v1 = vpop.f32.mrb[47].mxu1  ;;  %v1699_v13 = vmul.f32 0.5, %v1693_v42 }
0x1348   :  { %v1703_v2 = vmul.f32 %v1701_v63, %v1693_v42  ;;  %v1702_v3 = vmul.f32 0.044715, %v1696_v0  ;;  %v1700_v14 = vmul.f32 0.5, %v1696_v0 }
0x134a   :  { %v1705_v4 = vmul.f32 %v1703_v2, %v1693_v42  ;;  %v1704_v59 = vmul.f32 %v1702_v3, %v1696_v0 }
0x134c   :  { %v1707_v5 = vadd.f32 %v1705_v4, %v1693_v42  ;;  %v1706_v6 = vmul.f32 %v1704_v59, %v1696_v0 }
0x134e   :  { %v1709_v7 = vmul.f32 0.7978846, %v1707_v5  ;;  %v1708_v15 = vadd.f32 %v1706_v6, %v1696_v0 }
0x1350   :  { %2270 = vtanh.f32 %v1709_v7  ;;  %v1710_v8 = vmul.f32 0.7978846, %v1708_v15 }
0x1352   :  { %2272 = vtanh.f32 %v1710_v8 }
0x135a   :  { %v2271_v9 = vpop.eup %2270 }
0x135b   :  { %v1713_v10 = vadd.f32 1.0, %v2271_v9 }
0x135c   :  { %v2273_v12 = vpop.eup %2272 }
0x135d   :  { %v1714_v16 = vadd.f32 1.0, %v2273_v12  ;;  %v1715_v17 = vmul.f32 %v1713_v10, %v1699_v13 }
0x135f   :  { %v1716_v18 = vmul.f32 %v1714_v16, %v1700_v14 }
0x1361   :  { %v1726_v11 = vpack.c.bf16 %v1716_v18, %v1715_v17 }
0x1363   :  { %2184 = vmatmul.mubr.msk.bf16.vlgmr.msra.gmra.mrb[44].mxu0 %vm888_vm6, %v1726_v11 }
0x1436   :  { %v1796_v22 = vpop.f32.mrb[44].mxu0 }
0x1437   :  { %v1797_v23 = vadd.f32 %v1949_v19, %v1796_v22  ;;  %v2185_v24 = vpop.f32.mrb[45].mxu0 }
0x1438   :  { %v1799_v25 = vpop.f32.mrb[46].mxu0 }
0x1439   :  { %v1800_v26 = vadd.f32 %v1949_v19, %v1799_v25  ;;  %v2186_v27 = vpop.f32.mrb[47].mxu0  ;;  %v1803_v29 = vadd.f32 %v1797_v23, %v1627_v54  ;;  %v1958_v54 = vld [vmem:[%s2802_s15 + $0x1] ss:$0 sm:$0xff] }
0x143b   :  { %v1809_v30 = vsel %vm59_vm0, %v1803_v29, 0.0  ;;  %v1804_v34 = vadd.f32 %v1800_v26, %v1628_v55 }
0x143c   :  { %1810 = vadd.xlane.f32.xlu0 %v1809_v30 }
0x143d   :  { %v1812_v35 = vsel %vm59_vm0, %v1804_v34, 0.0 }
0x143e   :  { %1813 = vadd.xlane.f32.xlu1 %v1812_v35 }
0x14c9   :  { %v1811_v36 = vpop.xlane.xlu0 %1810 }
0x14ca   :  { %v1815_v37 = vmul.f32 0.03125, %v1811_v36 }
0x14cb   :  { %v1814_v38 = vpop.xlane.xlu1 %1813 }
0x14cc   :  { %v1817_v20 = vsub.f32 %v1803_v29, %v1815_v37  ;;  %v1816_v21 = vmul.f32 0.03125, %v1814_v38 }
0x14ce   :  { %v1818_v28 = vsub.f32 %v1804_v34, %v1816_v21  ;;  %v1819_v40 = vmul.f32 %v1817_v20, %v1817_v20 }
0x14d0   :  { %v1821_v41 = vsel %vm59_vm0, %v1819_v40, 0.0  ;;  %v1820_v43 = vmul.f32 %v1818_v28, %v1818_v28 }
0x14d1   :  { %1822 = vadd.xlane.f32.xlu0 %v1821_v41 }
0x14d2   :  { %v1824_v44 = vsel %vm59_vm0, %v1820_v43, 0.0 }
0x14d3   :  { %1825 = vadd.xlane.f32.xlu1 %v1824_v44 }
0x155e   :  { %v1823_v33 = vpop.xlane.xlu0 %1822 }
0x155f   :  { %v1827_v45 = vmul.f32 0.03125, %v1823_v33 }
0x1560   :  { %v1826_v46 = vpop.xlane.xlu1 %1825 }
0x1561   :  { %v1829_v47 = vadd.f32 1e-12, %v1827_v45  ;;  %v1828_v48 = vmul.f32 0.03125, %v1826_v46 }
0x1563   :  { %2274 = vrsqrt.f32 %v1829_v47  ;;  %v1830_v49 = vadd.f32 1e-12, %v1828_v48 }
0x1565   :  { %2276 = vrsqrt.f32 %v1830_v49 }
0x156d   :  { %v2275_v50 = vpop.eup %2274 }
0x156e   :  { %v1833_v52 = vmul.f32 %v2275_v50, %v1817_v20 }
0x156f   :  { %v2277_v53 = vpop.eup %2276 }
0x1570   :  { %v1834_v55 = vmul.f32 %v2277_v53, %v1818_v28  ;;  %v1841_v39 = vmul.f32 %v1957_v51, %v1833_v52 }
0x1572   :  { %v1842_v56 = vmul.f32 %v1957_v51, %v1834_v55  ;;  %v1849_v57 = vadd.f32 %v1958_v54, %v1841_v39 }
0x1574   :  { %v1850_v31 = vadd.f32 %v1958_v54, %v1842_v56  ;;  %1851 = vst.msk [vmem:[#allocation3] sm:$0xff] %vm59_vm0, %v1849_v57 }
0x1576   :  { %1852 = vst.msk [vmem:[#allocation3 + $0x8] sm:$0xff] %vm59_vm0, %v1850_v31 }
0x1577   :  { %2289 = shalt.err (!%p2286_p4)
}
0x1578   :  { %s2290_s1 = scalar_lea.hbm %s2803_s16, 256 }
0x1579   :  { %p2291_p5 = scmp.ne.s32.totalorder %s2803_s16, %s2290_s1  ;;  %p2294_p6 = scmp.lt.u32.totalorder %s2290_s1, %s2803_s16 }
0x157b   :  { %p2296_p7 = pnand %p2294_p6, %p2291_p5 }
0x157d   :  { %2299 = shalt.err (!%p2296_p7)
}
0x157e   :  { %s2311_s26 = smov 128   ;;  %s2312_s27 = smov 8  }
0x157f   :  { %1864 = dma.vmem_to_hbm [thread:$0]  %s1859_s21, 256, %s2803_s16, [#allocation4], %s2311_s26, %s2311_s26, %s2312_s27  }
0x1580   :  { %2300 = dma.done.wait [#allocation4], 256  }
0x1581   :  { %2301 = vsyncadd [#allocation4], 4294967040 }
0x1582   :  { %1868 = vsyncpa [#allocation4], 1 }

</bundles_post_ra>
